<compile_context>
chip_gen: v5e
topology: v5e:2x2
jax: 0.10.0
libtpu: 0.0.40
codegen_flags: <defaults>
</compile_context>

<pallas_src>
from functools import partial

import numpy as np
import jax
import jax.numpy as jnp
from jax.experimental import pallas as pl
from jax.experimental.pallas import tpu as pltpu

C_IN = 4
NUM_CLASSES = 10
BN_EPS = 1e-5
LANES = 128
SUB = 16  # sublane alignment covering bf16 (16) and f32 (8) packing


def _round_up(x, m):
    return (x + m - 1) // m * m


def _pool_matrix():
    # AvgPool2d(5, stride=3, padding=0) on 8x8 -> 2x2; count_include_pad is moot
    # (no padding, every window is a full 5x5), so each tap weighs 1/25.
    pool = np.zeros((4, 64), np.float32)
    for oh in range(2):
        for ow in range(2):
            p = oh * 2 + ow
            for kh in range(5):
                for kw in range(5):
                    s = (oh * 3 + kh) * 8 + (ow * 3 + kw)
                    pool[p, s] = 1.0 / 25.0
    return jnp.asarray(pool)


def _fold_bn(gamma, beta, mean, var):
    scale = gamma / jnp.sqrt(var + BN_EPS)
    bias = beta - mean * scale
    return scale, bias


def _aux_head_kernel(x_ref, w01_ref, b1_ref, w2_ref, b2_ref, wc_ref, bc_ref, o_ref):
    # x_ref: (B_TILE, 64*C) bf16, NCHW-flattened (index c*64 + h*8 + w).
    x = jnp.maximum(x_ref[...], 0)                                      # ReLU (exact in bf16)
    # ReLU -> AvgPool(5,3) -> Conv1x1(C,128) -> BN1 fused into one bf16 matmul,
    # f32 accumulation; bias add + ReLU stay in f32.
    h1 = jnp.dot(x, w01_ref[...], preferred_element_type=jnp.float32) + b1_ref[...]
    h1 = jnp.maximum(h1, 0.0).astype(jnp.bfloat16)                      # (B, 512)
    # Conv2d(128,768,2) on the 2x2 map == single K=512 contraction; BN2 folded.
    h2 = jnp.dot(h1, w2_ref[...], preferred_element_type=jnp.float32) + b2_ref[...]
    h2 = jnp.maximum(h2, 0.0).astype(jnp.bfloat16)                      # (B, 768)
    # Linear(768, nc), output padded to a lane-dense 128-wide block.
    o_ref[...] = (jnp.dot(h2, wc_ref[...], preferred_element_type=jnp.float32)
                  + bc_ref[...]).astype(o_ref.dtype)


def init_params(key, c_in, num_classes):
    ks = jax.random.split(key, 12)
    w1 = jax.random.normal(ks[0], (128, c_in), jnp.float32) * 0.1          # Conv2d(C,128,1)
    w2 = jax.random.normal(ks[1], (768, 128, 2, 2), jnp.float32) * 0.05    # Conv2d(128,768,2)
    wc = jax.random.normal(ks[2], (num_classes, 768), jnp.float32) * 0.05  # Linear
    bc = jax.random.normal(ks[3], (num_classes,), jnp.float32) * 0.05
    g1 = 1.0 + 0.1 * jax.random.normal(ks[4], (128,), jnp.float32)
    be1 = 0.1 * jax.random.normal(ks[5], (128,), jnp.float32)
    m1 = 0.1 * jax.random.normal(ks[6], (128,), jnp.float32)
    v1 = jnp.abs(1.0 + 0.1 * jax.random.normal(ks[7], (128,), jnp.float32))
    g2 = 1.0 + 0.1 * jax.random.normal(ks[8], (768,), jnp.float32)
    be2 = 0.1 * jax.random.normal(ks[9], (768,), jnp.float32)
    m2 = 0.1 * jax.random.normal(ks[10], (768,), jnp.float32)
    v2 = jnp.abs(1.0 + 0.1 * jax.random.normal(ks[11], (768,), jnp.float32))
    return dict(w1=w1, w2=w2, wc=wc, bc=bc,
                g1=g1, be1=be1, m1=m1, v1=v1,
                g2=g2, be2=be2, m2=m2, v2=v2)


def fold_aux_head_params(params):
    """One-time weight folding (hoisted out of the per-call forward path)."""
    c = params["w1"].shape[1]
    nc = params["wc"].shape[0]
    assert nc <= LANES

    pool = _pool_matrix()                                 # (4, 64)
    w1t = jnp.transpose(params["w1"], (1, 0))             # (C, 128)
    s1, b1 = _fold_bn(params["g1"], params["be1"], params["m1"], params["v1"])
    s2, b2 = _fold_bn(params["g2"], params["be2"], params["m2"], params["v2"])

    # W01[c*64+s, p*128+o] = pool[p,s] * w1[o,c] * s1[o].  Row order c*64+s matches
    # a plain x_nchw.reshape(N, C*64), so no activation transpose is needed.
    w01 = jnp.einsum("ps,co->cspo", pool, w1t).reshape(64 * c, 4 * 128)
    w01 = (w01 * jnp.tile(s1, 4)[None, :]).astype(jnp.bfloat16)
    b1f = jnp.tile(b1, 4).reshape(1, 4 * 128).astype(jnp.float32)

    # Conv2 weight W2[o2, o, kh, kw] -> (p*128 + o, o2) with p = kh*2 + kw;
    # BN2 per-channel scale folded into the columns.
    w2r = jnp.transpose(params["w2"], (2, 3, 1, 0)).reshape(4 * 128, 768)
    w2r = (w2r * s2[None, :]).astype(jnp.bfloat16)
    b2f = b2.reshape(1, 768).astype(jnp.float32)

    # Classifier padded to 128 output lanes for a lane-dense final store.
    wc = jnp.zeros((768, LANES), jnp.float32).at[:, :nc].set(params["wc"].T)
    wc = wc.astype(jnp.bfloat16)
    bc = jnp.zeros((1, LANES), jnp.float32).at[0, :nc].set(params["bc"])
    return dict(w01=w01, b1f=b1f, w2r=w2r, b2f=b2f, wc=wc, bc=bc)


@partial(jax.jit, static_argnames=("num_classes", "b_tile"))
def aux_head_forward(x_nchw, folded, num_classes=NUM_CLASSES, b_tile=512):
    N, C, H, W = x_nchw.shape
    assert (H, W) == (8, 8), "AuxiliaryHeadCIFAR assumes an 8x8 input"
    w01, b1f = folded["w01"], folded["b1f"]
    w2r, b2f = folded["w2r"], folded["b2f"]
    wc, bc = folded["wc"], folded["bc"]
    k_in = w01.shape[0]
    assert k_in == 64 * C

    # NCHW flat index = c*64 + h*8 + w — zero-cost reshape, no transpose.
    x = x_nchw.reshape(N, k_in).astype(jnp.bfloat16)

    # Batch tiling: bt is sublane-aligned; ensure >= 2 grid steps when the batch
    # allows it so the "parallel" batch axis can split across both v7x TensorCores.
    n_al = _round_up(N, SUB)
    bt = min(_round_up(b_tile, SUB), n_al)
    if n_al > SUB and n_al <= bt:
        bt = _round_up((n_al + 1) // 2, SUB)
    n_pad = _round_up(N, bt)
    if n_pad != N:
        x = jnp.pad(x, ((0, n_pad - N), (0, 0)))
    steps = n_pad // bt

    weight_bytes = ((w01.size + w2r.size + wc.size) * 2
                    + (b1f.size + b2f.size + bc.size) * 4)
    cost = pl.CostEstimate(
        flops=2 * n_pad * (k_in * 512 + 512 * 768 + 768 * LANES),
        transcendentals=0,
        bytes_accessed=n_pad * k_in * 2 + n_pad * LANES * 4 + steps * weight_bytes)

    out = pl.pallas_call(
        _aux_head_kernel,
        out_shape=jax.ShapeDtypeStruct((n_pad, LANES), jnp.float32),
        grid_spec=pltpu.PrefetchScalarGridSpec(
            num_scalar_prefetch=0,
            grid=(steps,),
            in_specs=[
                pl.BlockSpec((bt, k_in), lambda n: (n, 0)),          # activations (bf16)
                pl.BlockSpec((k_in, 4 * 128), lambda n: (0, 0)),     # fused pool+conv1+bn1 (bf16)
                pl.BlockSpec((1, 4 * 128), lambda n: (0, 0)),        # bn1 bias (f32)
                pl.BlockSpec((4 * 128, 768), lambda n: (0, 0)),      # conv2+bn2 weight (bf16)
                pl.BlockSpec((1, 768), lambda n: (0, 0)),            # bn2 bias (f32)
                pl.BlockSpec((768, LANES), lambda n: (0, 0)),        # classifier weight (bf16, padded)
                pl.BlockSpec((1, LANES), lambda n: (0, 0)),          # classifier bias (f32, padded)
            ],
            out_specs=pl.BlockSpec((bt, LANES), lambda n: (n, 0)),
        ),
        compiler_params=pltpu.CompilerParams(
            dimension_semantics=("parallel",)),                      # batch-parallel (v7x 2 TCs)
        cost_estimate=cost,
    )(x, w01, b1f, w2r, b2f, wc, bc)
    return out[:N, :num_classes]


def reference_forward(x_nchw, p):
    """Pure-JAX f32 reference mirroring the PyTorch forward (eval-mode BN)."""
    x = jnp.maximum(x_nchw.astype(jnp.float32), 0.0)
    x = jax.lax.reduce_window(x, 0.0, jax.lax.add,
                              (1, 1, 5, 5), (1, 1, 3, 3), "VALID") / 25.0
    dn = ("NCHW", "OIHW", "NCHW")
    x = jax.lax.conv_general_dilated(x, p["w1"][:, :, None, None], (1, 1),
                                     "VALID", dimension_numbers=dn)
    x = ((x - p["m1"][None, :, None, None])
         / jnp.sqrt(p["v1"][None, :, None, None] + BN_EPS)
         * p["g1"][None, :, None, None] + p["be1"][None, :, None, None])
    x = jnp.maximum(x, 0.0)
    x = jax.lax.conv_general_dilated(x, p["w2"], (1, 1), "VALID",
                                     dimension_numbers=dn)
    x = ((x - p["m2"][None, :, None, None])
         / jnp.sqrt(p["v2"][None, :, None, None] + BN_EPS)
         * p["g2"][None, :, None, None] + p["be2"][None, :, None, None])
    x = jnp.maximum(x, 0.0)
    x = x.reshape(x.shape[0], -1)
    return x @ p["wc"].T + p["bc"]


if __name__ == "__main__":
    key = jax.random.PRNGKey(0)
    kx, kp, kx2 = jax.random.split(key, 3)
    params = init_params(kp, C_IN, NUM_CLASSES)
    folded = fold_aux_head_params(params)   # one-time weight folding (hoisted)

    # Small canonical test: batch=2, channels=4, 8x8 spatial (module's assumption).
    N = 2
    x = jax.random.normal(kx, (N, C_IN, 8, 8), jnp.float32)   # PyTorch NCHW input
    out = jax.block_until_ready(aux_head_forward(x, folded, num_classes=NUM_CLASSES))
    ref = jax.block_until_ready(reference_forward(x, params))
    assert out.shape == (N, NUM_CLASSES)
    # bf16 matmul inputs (f32 accumulation) => looser tolerance vs the f32 reference.
    np.testing.assert_allclose(np.asarray(out), np.asarray(ref), rtol=2e-2, atol=2e-2)

    # Larger batch exercising the padded multi-step (dual-TC-splittable) grid path.
    N2 = 130
    x2 = jax.random.normal(kx2, (N2, C_IN, 8, 8), jnp.float32)
    out2 = jax.block_until_ready(aux_head_forward(x2, folded, num_classes=NUM_CLASSES))
    ref2 = jax.block_until_ready(reference_forward(x2, params))
    assert out2.shape == (N2, NUM_CLASSES)
    np.testing.assert_allclose(np.asarray(out2), np.asarray(ref2), rtol=2e-2, atol=2e-2)

    print("KERNEL_OK")
</pallas_src>

<mosaic_0001>
module attributes {stable_mosaic.version = 11 : i64} {
  func.func @_aux_head_kernel(%arg0: i32, %arg1: memref<16x256xbf16, #tpu.memory_space<vmem>>, %arg2: memref<256x512xbf16, #tpu.memory_space<vmem>>, %arg3: memref<1x512xf32, #tpu.memory_space<vmem>>, %arg4: memref<512x768xbf16, #tpu.memory_space<vmem>>, %arg5: memref<1x768xf32, #tpu.memory_space<vmem>>, %arg6: memref<768x128xbf16, #tpu.memory_space<vmem>>, %arg7: memref<1x128xf32, #tpu.memory_space<vmem>>, %arg8: memref<16x128xf32, #tpu.memory_space<vmem>>) attributes {dimension_semantics = [#tpu.dimension_semantics<parallel>], iteration_bounds = array<i64: 1>, scalar_prefetch = 0 : i64, scratch_operands = 0 : i64, tpu.core_type = #tpu.core_type<tc>, window_params = [{transform_indices = @transform_0, window_bounds = array<i64: 16, 256>}, {pipeline_mode = #tpu.pipeline_mode<synchronous>, transform_indices = @transform_1, window_bounds = array<i64: 256, 512>}, {pipeline_mode = #tpu.pipeline_mode<synchronous>, transform_indices = @transform_2, window_bounds = array<i64: 1, 512>}, {pipeline_mode = #tpu.pipeline_mode<synchronous>, transform_indices = @transform_3, window_bounds = array<i64: 512, 768>}, {pipeline_mode = #tpu.pipeline_mode<synchronous>, transform_indices = @transform_4, window_bounds = array<i64: 1, 768>}, {pipeline_mode = #tpu.pipeline_mode<synchronous>, transform_indices = @transform_5, window_bounds = array<i64: 768, 128>}, {pipeline_mode = #tpu.pipeline_mode<synchronous>, transform_indices = @transform_6, window_bounds = array<i64: 1, 128>}, {transform_indices = @transform_7, window_bounds = array<i64: 16, 128>}]} {
    %c0 = arith.constant 0 : index
    %c0_0 = arith.constant 0 : index
    %0 = vector.load %arg1[%c0, %c0_0] : memref<16x256xbf16, #tpu.memory_space<vmem>>, vector<16x256xbf16>
    %cst = arith.constant 0.000000e+00 : bf16
    %1 = vector.broadcast %cst : bf16 to vector<16x256xbf16>
    %2 = arith.maximumf %0, %1 : vector<16x256xbf16>
    %c0_1 = arith.constant 0 : index
    %c0_2 = arith.constant 0 : index
    %3 = vector.load %arg2[%c0_1, %c0_2] : memref<256x512xbf16, #tpu.memory_space<vmem>>, vector<256x512xbf16>
    %cst_3 = arith.constant dense<0.000000e+00> : vector<16x512xf32>
    %4 = tpu.matmul %2, %3, %cst_3 {dimension_numbers = #tpu.dot_dimension_numbers<[1], [0], [0], [1], [0, 0, 1, 1], [], []>} : vector<16x256xbf16>, vector<256x512xbf16>, vector<16x512xf32> -> vector<16x512xf32>
    %c0_4 = arith.constant 0 : index
    %c0_5 = arith.constant 0 : index
    %5 = vector.load %arg3[%c0_4, %c0_5] : memref<1x512xf32, #tpu.memory_space<vmem>>, vector<1x512xf32>
    %6 = vector.broadcast %5 : vector<1x512xf32> to vector<16x512xf32>
    %7 = arith.addf %4, %6 : vector<16x512xf32>
    %cst_6 = arith.constant 0.000000e+00 : f32
    %8 = vector.broadcast %cst_6 : f32 to vector<16x512xf32>
    %9 = arith.maximumf %7, %8 : vector<16x512xf32>
    %10 = arith.truncf %9 : vector<16x512xf32> to vector<16x512xbf16>
    %c0_7 = arith.constant 0 : index
    %c0_8 = arith.constant 0 : index
    %11 = vector.load %arg4[%c0_7, %c0_8] : memref<512x768xbf16, #tpu.memory_space<vmem>>, vector<512x768xbf16>
    %cst_9 = arith.constant dense<0.000000e+00> : vector<16x768xf32>
    %12 = tpu.matmul %10, %11, %cst_9 {dimension_numbers = #tpu.dot_dimension_numbers<[1], [0], [0], [1], [0, 0, 1, 1], [], []>} : vector<16x512xbf16>, vector<512x768xbf16>, vector<16x768xf32> -> vector<16x768xf32>
    %c0_10 = arith.constant 0 : index
    %c0_11 = arith.constant 0 : index
    %13 = vector.load %arg5[%c0_10, %c0_11] : memref<1x768xf32, #tpu.memory_space<vmem>>, vector<1x768xf32>
    %14 = vector.broadcast %13 : vector<1x768xf32> to vector<16x768xf32>
    %15 = arith.addf %12, %14 : vector<16x768xf32>
    %cst_12 = arith.constant 0.000000e+00 : f32
    %16 = vector.broadcast %cst_12 : f32 to vector<16x768xf32>
    %17 = arith.maximumf %15, %16 : vector<16x768xf32>
    %18 = arith.truncf %17 : vector<16x768xf32> to vector<16x768xbf16>
    %c0_13 = arith.constant 0 : index
    %c0_14 = arith.constant 0 : index
    %19 = vector.load %arg6[%c0_13, %c0_14] : memref<768x128xbf16, #tpu.memory_space<vmem>>, vector<768x128xbf16>
    %cst_15 = arith.constant dense<0.000000e+00> : vector<16x128xf32>
    %20 = tpu.matmul %18, %19, %cst_15 {dimension_numbers = #tpu.dot_dimension_numbers<[1], [0], [0], [1], [0, 0, 1, 1], [], []>} : vector<16x768xbf16>, vector<768x128xbf16>, vector<16x128xf32> -> vector<16x128xf32>
    %c0_16 = arith.constant 0 : index
    %c0_17 = arith.constant 0 : index
    %21 = vector.load %arg7[%c0_16, %c0_17] : memref<1x128xf32, #tpu.memory_space<vmem>>, vector<1x128xf32>
    %22 = vector.broadcast %21 : vector<1x128xf32> to vector<16x128xf32>
    %23 = arith.addf %20, %22 : vector<16x128xf32>
    %c0_18 = arith.constant 0 : index
    %c0_19 = arith.constant 0 : index
    %24 = vector.load %arg8[%c0_18, %c0_19] : memref<16x128xf32, #tpu.memory_space<vmem>>, vector<16x128xf32>
    tpu.vector_store %arg8[%c0_18, %c0_19], %23 {strides = array<i32>} : memref<16x128xf32, #tpu.memory_space<vmem>>, vector<16x128xf32>,
    return
  }
  func.func @transform_0(%arg0: i32) -> (i32, i32) {
    %c0_i32 = arith.constant 0 : i32
    %c0_i32_0 = arith.constant 0 : i32
    return %arg0, %c0_i32 : i32, i32
  }
  func.func @transform_1(%arg0: i32) -> (i32, i32) {
    %c0_i32 = arith.constant 0 : i32
    %c0_i32_0 = arith.constant 0 : i32
    %c0_i32_1 = arith.constant 0 : i32
    return %c0_i32, %c0_i32_0 : i32, i32
  }
  func.func @transform_2(%arg0: i32) -> (i32, i32) {
    %c0_i32 = arith.constant 0 : i32
    %c0_i32_0 = arith.constant 0 : i32
    %c0_i32_1 = arith.constant 0 : i32
    return %c0_i32, %c0_i32_0 : i32, i32
  }
  func.func @transform_3(%arg0: i32) -> (i32, i32) {
    %c0_i32 = arith.constant 0 : i32
    %c0_i32_0 = arith.constant 0 : i32
    %c0_i32_1 = arith.constant 0 : i32
    return %c0_i32, %c0_i32_0 : i32, i32
  }
  func.func @transform_4(%arg0: i32) -> (i32, i32) {
    %c0_i32 = arith.constant 0 : i32
    %c0_i32_0 = arith.constant 0 : i32
    %c0_i32_1 = arith.constant 0 : i32
    return %c0_i32, %c0_i32_0 : i32, i32
  }
  func.func @transform_5(%arg0: i32) -> (i32, i32) {
    %c0_i32 = arith.constant 0 : i32
    %c0_i32_0 = arith.constant 0 : i32
    %c0_i32_1 = arith.constant 0 : i32
    return %c0_i32, %c0_i32_0 : i32, i32
  }
  func.func @transform_6(%arg0: i32) -> (i32, i32) {
    %c0_i32 = arith.constant 0 : i32
    %c0_i32_0 = arith.constant 0 : i32
    %c0_i32_1 = arith.constant 0 : i32
    return %c0_i32, %c0_i32_0 : i32, i32
  }
  func.func @transform_7(%arg0: i32) -> (i32, i32) {
    %c0_i32 = arith.constant 0 : i32
    %c0_i32_0 = arith.constant 0 : i32
    return %arg0, %c0_i32 : i32, i32
  }
}

</mosaic_0001>

<bundles_post_ra>
// kernel: aux_head_forward.1
= control target key start
LH: loop header
LB: loop body
LE: loop exit
PB: predicated region body
PF: predicated region fallthrough
CT: control target
= control target key end

     0   :  { %12 = vsyncpa [#allocation3], 0  ;;  %s4346_s0 = inlined_call_operand.vmem [shape: bf16[16,256], index: 0, kind: input, shape index: {}]   ;;  %s4347_s1 = inlined_call_operand.hbm [shape: bf16[256,512], index: 1, kind: input, shape index: {}]   ;;  %s4348_s2 = inlined_call_operand.vmem [shape: f32[1,512], index: 2, kind: input, shape index: {}]   ;;  %s4349_s3 = inlined_call_operand.hbm [shape: bf16[512,768], index: 3, kind: input, shape index: {}]   ;;  %s4350_s4 = inlined_call_operand.vmem [shape: f32[1,768], index: 4, kind: input, shape index: {}]   ;;  %s4351_s5 = inlined_call_operand.hbm [shape: bf16[768,128], index: 5, kind: input, shape index: {}]   ;;  %s4352_s6 = inlined_call_operand.vmem [shape: f32[1,128], index: 6, kind: input, shape index: {}]   ;;  %s4353_s7 = inlined_call_operand.vmem [shape: f32[16,128], index: 7, kind: output, shape index: {}]  }
   0x1   :  { %13 = vsyncpa [#allocation5], 0  ;;  %s35_s26 = sshll.u32 %s4349_s3, 4  ;;  %s4209_s27 = smov [#allocation4]   ;;  %s36_s26 = int_to_ptr.hbm [resolvable:$true] %s35_s26 }
   0x2   :  { %s37_s28 = sshll.u32 %s4209_s27, 4  ;;  %s20_s8 = sshll.u32 %s4347_s1, 4  ;;  %s38_s28 = int_to_ptr.vmem [resolvable:$true] %s37_s28  ;;  %s21_s8 = int_to_ptr.hbm [resolvable:$true] %s20_s8 }
   0x3   :  { %s4210_s9 = smov 384   ;;  %s4211_s10 = smov 24  }
   0x4   :  { %43 = dma.hbm_to_vmem [thread:$0]  %s36_s26, 24576, %s38_s28, [#allocation5], %s4210_s9, %s4210_s9, %s4211_s10  }
   0x5   :  { %s4212_s11 = smov [#allocation2]   ;;  %s4213_s13 = smov 256  }
   0x6   :  { %s22_s12 = sshll.u32 %s4212_s11, 4  ;;  %s4214_s14 = smov 16   ;;  %s23_s12 = int_to_ptr.vmem [resolvable:$true] %s22_s12 }
   0x7   :  { %28 = dma.hbm_to_vmem [thread:$0]  %s21_s8, 8192, %s23_s12, [#allocation3], %s4213_s13, %s4213_s13, %s4214_s14  }
   0x8   :  { %s50_s16 = sshll.u32 %s4351_s5, 4  ;;  %s4215_s17 = smov [#allocation6]   ;;  %s51_s16 = int_to_ptr.hbm [resolvable:$true] %s50_s16 }
   0x9   :  { %s52_s18 = sshll.u32 %s4215_s17, 4  ;;  %s4216_s19 = smov 64   ;;  %s53_s18 = int_to_ptr.vmem [resolvable:$true] %s52_s18 }
   0xa   :  { %s4217_s1 = smov 4  }
   0xb   :  { %58 = dma.hbm_to_vmem [thread:$0]  %s51_s16, 6144, %s53_s18, [#allocation5], %s4216_s19, %s4216_s19, %s4217_s1  }
   0xc   :  { %4205 = dma.done.wait [#allocation3], 8192  }
   0xd   :  { %4206 = vsyncadd [#allocation3], 4294959104 }
   0xe   :  { %4207 = dma.done.wait [#allocation5], 30720  }
   0xf   :  { %4208 = vsyncadd [#allocation5], 4294936576  ;;  %v2717_v0 = vld [vmem:[#allocation2 + $0xe0] sm:$0xf]  ;;  %v3849_v1 = vld [vmem:[#allocation2 + $0xec] sm:$0xf0] }
  0x10   :  { %v2845_v2 = vld [vmem:[#allocation2 + $0x1e0] sm:$0xf]  ;;  %v2718_v3 = vor.u32 %v3849_v1, %v2717_v0  ;;  %v3881_v4 = vld [vmem:[#allocation2 + $0x1ec] sm:$0xf0]  ;;  %v3847_v5 = vld [vmem:[#allocation2 + $0xe4] sm:$0xf] }
  0x11   :  { %v2719_v6 = vld [vmem:[#allocation2 + $0xf0] sm:$0xf0]  ;;  %v2846_v7 = vor.u32 %v3881_v4, %v2845_v2  ;;  %v3879_v9 = vld [vmem:[#allocation2 + $0x1e4] sm:$0xf]  ;;  %v2701_v11 = vld [vmem:[#allocation2 + $0xc0] sm:$0xf] }
  0x12   :  { %v2722_v8 = vor.u32 %v3847_v5, %v2719_v6  ;;  %v2847_v10 = vld [vmem:[#allocation2 + $0x1f0] sm:$0xf0]  ;;  %479 = vmatpush.bf16.msra.mxu0 %v2718_v3  ;;  %v3845_v13 = vld [vmem:[#allocation2 + $0xcc] sm:$0xf0]  ;;  %v2829_v14 = vld [vmem:[#allocation2 + $0x1c0] sm:$0xf] }
  0x13   :  { %v2850_v12 = vor.u32 %v3879_v9, %v2847_v10  ;;  %v3877_v15 = vld [vmem:[#allocation2 + $0x1cc] sm:$0xf0]  ;;  %493 = vmatpush.bf16.msra.mxu1 %v2846_v7  ;;  %v2702_v16 = vor.u32 %v3845_v13, %v2701_v11  ;;  %v3843_v18 = vld [vmem:[#allocation2 + $0xc4] sm:$0xf]  ;;  %v2703_v19 = vld [vmem:[#allocation2 + $0xd0] sm:$0xf0] }
  0x14   :  { %507 = vmatpush.bf16.msra.mxu2 %v2722_v8  ;;  %v2830_v17 = vor.u32 %v3877_v15, %v2829_v14  ;;  %v3875_v20 = vld [vmem:[#allocation2 + $0x1c4] sm:$0xf]  ;;  %v2706_v21 = vor.u32 %v3843_v18, %v2703_v19  ;;  %v2831_v22 = vld [vmem:[#allocation2 + $0x1d0] sm:$0xf0]  ;;  %v2685_v23 = vld [vmem:[#allocation2 + $0xa0] sm:$0xf] }
  0x15   :  { %521 = vmatpush.bf16.msra.mxu3 %v2850_v12  ;;  %v3841_v24 = vld [vmem:[#allocation2 + $0xac] sm:$0xf0]  ;;  %v2834_v25 = vor.u32 %v3875_v20, %v2831_v22  ;;  %v2813_v26 = vld [vmem:[#allocation2 + $0x1a0] sm:$0xf]  ;;  %v3839_v28 = vld [vmem:[#allocation2 + $0xa4] sm:$0xf] }
  0x16   :  { %v3873_v27 = vld [vmem:[#allocation2 + $0x1ac] sm:$0xf0]  ;;  %480 = vmatpush.bf16.msra.mxu0 %v2702_v16  ;;  %v2686_v29 = vor.u32 %v3841_v24, %v2685_v23  ;;  %v2687_v30 = vld [vmem:[#allocation2 + $0xb0] sm:$0xf0]  ;;  %v3871_v31 = vld [vmem:[#allocation2 + $0x1a4] sm:$0xf] }
  0x17   :  { %v2815_v32 = vld [vmem:[#allocation2 + $0x1b0] sm:$0xf0]  ;;  %494 = vmatpush.bf16.msra.mxu1 %v2830_v17  ;;  %v2814_v33 = vor.u32 %v3873_v27, %v2813_v26  ;;  %v2690_v34 = vor.u32 %v3839_v28, %v2687_v30  ;;  %v2669_v35 = vld [vmem:[#allocation2 + $0x80] sm:$0xf]  ;;  %v3837_v36 = vld [vmem:[#allocation2 + $0x8c] sm:$0xf0] }
  0x18   :  { %508 = vmatpush.bf16.msra.mxu2 %v2706_v21  ;;  %v2797_v37 = vld [vmem:[#allocation2 + $0x180] sm:$0xf]  ;;  %v2818_v38 = vor.u32 %v3871_v31, %v2815_v32  ;;  %v3869_v39 = vld [vmem:[#allocation2 + $0x18c] sm:$0xf0]  ;;  %v3835_v40 = vld [vmem:[#allocation2 + $0x84] sm:$0xf]  ;;  %v2670_v44 = vor.u32 %v3837_v36, %v2669_v35 }
  0x19   :  { %522 = vmatpush.bf16.msra.mxu3 %v2834_v25  ;;  %v2671_v41 = vld [vmem:[#allocation2 + $0x90] sm:$0xf0]  ;;  %v3867_v42 = vld [vmem:[#allocation2 + $0x184] sm:$0xf]  ;;  %v2798_v45 = vor.u32 %v3869_v39, %v2797_v37  ;;  %v2653_v47 = vld [vmem:[#allocation2 + $0x60] sm:$0xf] }
  0x1a   :  { %v2799_v43 = vld [vmem:[#allocation2 + $0x190] sm:$0xf0]  ;;  %481 = vmatpush.bf16.msra.mxu0 %v2686_v29  ;;  %v2674_v46 = vor.u32 %v3835_v40, %v2671_v41  ;;  %v3833_v48 = vld [vmem:[#allocation2 + $0x6c] sm:$0xf0]  ;;  %v2781_v49 = vld [vmem:[#allocation2 + $0x160] sm:$0xf] }
  0x1b   :  { %495 = vmatpush.bf16.msra.mxu1 %v2814_v33  ;;  %v2802_v50 = vor.u32 %v3867_v42, %v2799_v43  ;;  %v3865_v51 = vld [vmem:[#allocation2 + $0x16c] sm:$0xf0]  ;;  %v3831_v52 = vld [vmem:[#allocation2 + $0x64] sm:$0xf]  ;;  %v2655_v53 = vld [vmem:[#allocation2 + $0x70] sm:$0xf0]  ;;  %v2654_v56 = vor.u32 %v3833_v48, %v2653_v47 }
  0x1c   :  { %509 = vmatpush.bf16.msra.mxu2 %v2690_v34  ;;  %v3863_v54 = vld [vmem:[#allocation2 + $0x164] sm:$0xf]  ;;  %v2783_v55 = vld [vmem:[#allocation2 + $0x170] sm:$0xf0]  ;;  %v2782_v57 = vor.u32 %v3865_v51, %v2781_v49  ;;  %v2658_v58 = vor.u32 %v3831_v52, %v2655_v53  ;;  %v2637_v59 = vld [vmem:[#allocation2 + $0x40] sm:$0xf] }
  0x1d   :  { %523 = vmatpush.bf16.msra.mxu3 %v2818_v38  ;;  %v3829_v60 = vld [vmem:[#allocation2 + $0x4c] sm:$0xf0]  ;;  %v2765_v61 = vld [vmem:[#allocation2 + $0x140] sm:$0xf]  ;;  %v2786_v62 = vor.u32 %v3863_v54, %v2783_v55  ;;  %v3827_v0 = vld [vmem:[#allocation2 + $0x44] sm:$0xf] }
  0x1e   :  { %482 = vmatpush.bf16.msra.mxu0 %v2670_v44  ;;  %v3861_v63 = vld [vmem:[#allocation2 + $0x14c] sm:$0xf0]  ;;  %v2639_v1 = vld [vmem:[#allocation2 + $0x50] sm:$0xf0]  ;;  %v3859_v2 = vld [vmem:[#allocation2 + $0x144] sm:$0xf]  ;;  %v2638_v4 = vor.u32 %v3829_v60, %v2637_v59 }
  0x1f   :  { %496 = vmatpush.bf16.msra.mxu1 %v2798_v45  ;;  %v2767_v3 = vld [vmem:[#allocation2 + $0x150] sm:$0xf0]  ;;  %v2621_v5 = vld [vmem:[#allocation2 + $0x20] sm:$0xf]  ;;  %v3825_v6 = vld [vmem:[#allocation2 + $0x2c] sm:$0xf0]  ;;  %v2766_v7 = vor.u32 %v3861_v63, %v2765_v61  ;;  %v2642_v8 = vor.u32 %v3827_v0, %v2639_v1 }
  0x20   :  { %510 = vmatpush.bf16.msra.mxu2 %v2674_v46  ;;  %v2749_v9 = vld [vmem:[#allocation2 + $0x120] sm:$0xf]  ;;  %v3857_v10 = vld [vmem:[#allocation2 + $0x12c] sm:$0xf0]  ;;  %v3823_v11 = vld [vmem:[#allocation2 + $0x24] sm:$0xf]  ;;  %v2770_v12 = vor.u32 %v3859_v2, %v2767_v3  ;;  %v2622_v18 = vor.u32 %v3825_v6, %v2621_v5 }
  0x21   :  { %524 = vmatpush.bf16.msra.mxu3 %v2802_v50  ;;  %v2623_v13 = vld [vmem:[#allocation2 + $0x30] sm:$0xf0]  ;;  %v3855_v14 = vld [vmem:[#allocation2 + $0x124] sm:$0xf]  ;;  %v2605_v16 = vld [vmem:[#allocation2] sm:$0xf]  ;;  %v2750_v22 = vor.u32 %v3857_v10, %v2749_v9 }
  0x22   :  { %483 = vmatpush.bf16.msra.mxu0 %v2654_v56  ;;  %v2751_v15 = vld [vmem:[#allocation2 + $0x130] sm:$0xf0]  ;;  %v3821_v17 = vld [vmem:[#allocation2 + $0xc] sm:$0xf0]  ;;  %v2733_v19 = vld [vmem:[#allocation2 + $0x100] sm:$0xf]  ;;  %v2626_v23 = vor.u32 %v3823_v11, %v2623_v13 }
  0x23   :  { %497 = vmatpush.bf16.msra.mxu1 %v2782_v57  ;;  %v3853_v20 = vld [vmem:[#allocation2 + $0x10c] sm:$0xf0]  ;;  %v3819_v21 = vld [vmem:[#allocation2 + $0x4] sm:$0xf]  ;;  %v2754_v24 = vor.u32 %v3855_v14, %v2751_v15  ;;  %v2607_v25 = vld [vmem:[#allocation2 + $0x10] sm:$0xf0]  ;;  %v2606_v38 = vor.u32 %v3821_v17, %v2605_v16 }
  0x24   :  { %511 = vmatpush.bf16.msra.mxu2 %v2658_v58  ;;  %v73_v26 = vld [vmem:[%s4346_s0] sm:$0xff]  ;;  %v74_v27 = vld [vmem:[%s4346_s0 + $0x8] sm:$0xff]  ;;  %v2735_v29 = vld [vmem:[#allocation2 + $0x110] sm:$0xf0]  ;;  %v2734_v43 = vor.u32 %v3853_v20, %v2733_v19  ;;  %v2610_v44 = vor.u32 %v3819_v21, %v2607_v25 }
  0x25   :  { %525 = vmatpush.bf16.msra.mxu3 %v2786_v62  ;;  %v3851_v28 = vld [vmem:[#allocation2 + $0x104] sm:$0xf]  ;;  %v2725_v30 = vld [vmem:[#allocation2 + $0xe8] sm:$0xf]  ;;  %v75_v31 = vunpack.c.l.bf16 %v73_v26  ;;  %v77_v32 = vunpack.c.l.bf16 %v74_v27  ;;  %v76_v33 = vunpack.c.h.bf16 %v73_v26  ;;  %v78_v34 = vunpack.c.h.bf16 %v74_v27  ;;  %v3850_v35 = vld [vmem:[#allocation2 + $0xf4] sm:$0xf0] }
  0x26   :  { %484 = vmatpush.bf16.msra.mxu0 %v2638_v4  ;;  %v2853_v36 = vld [vmem:[#allocation2 + $0x1e8] sm:$0xf]  ;;  %v3882_v37 = vld [vmem:[#allocation2 + $0x1f4] sm:$0xf0]  ;;  %v3848_v39 = vld [vmem:[#allocation2 + $0xec] sm:$0xf]  ;;  %v2738_v49 = vor.u32 %v3851_v28, %v2735_v29  ;;  %v2726_v50 = vor.u32 %v3850_v35, %v2725_v30 }
  0x27   :  { %498 = vmatpush.bf16.msra.mxu1 %v2766_v7  ;;  %v2727_v40 = vld [vmem:[#allocation2 + $0xf8] sm:$0xf0]  ;;  %v79_v41 = vmax.f32 %v75_v31, 0.0  ;;  %v81_v42 = vmax.f32 %v77_v32, 0.0  ;;  %v3880_v45 = vld [vmem:[#allocation2 + $0x1ec] sm:$0xf]  ;;  %v2854_v51 = vor.u32 %v3882_v37, %v2853_v36 }
  0x28   :  { %512 = vmatpush.bf16.msra.mxu2 %v2642_v8  ;;  %v2855_v46 = vld [vmem:[#allocation2 + $0x1f8] sm:$0xf0]  ;;  %v80_v47 = vmax.f32 %v76_v33, 0.0  ;;  %v82_v48 = vmax.f32 %v78_v34, 0.0  ;;  %v2730_v52 = vor.u32 %v3848_v39, %v2727_v40  ;;  %v2709_v53 = vld [vmem:[#allocation2 + $0xc8] sm:$0xf] }
  0x29   :  { %526 = vmatpush.bf16.msra.mxu3 %v2770_v12  ;;  %v3846_v54 = vld [vmem:[#allocation2 + $0xd4] sm:$0xf0]  ;;  %v2837_v55 = vld [vmem:[#allocation2 + $0x1c8] sm:$0xf]  ;;  %v2858_v56 = vor.u32 %v3880_v45, %v2855_v46  ;;  %v4273_v57 = vpack.c.bf16 %v81_v42, %v79_v41  ;;  %v3844_v59 = vld [vmem:[#allocation2 + $0xcc] sm:$0xf] }
  0x2a   :  { %485 = vmatpush.bf16.msra.mxu0 %v2622_v18  ;;  %v3878_v58 = vld [vmem:[#allocation2 + $0x1d4] sm:$0xf0]  ;;  %v2711_v60 = vld [vmem:[#allocation2 + $0xd8] sm:$0xf0]  ;;  %v4275_v61 = vpack.c.bf16 %v82_v48, %v80_v47  ;;  %v3876_v62 = vld [vmem:[#allocation2 + $0x1cc] sm:$0xf]  ;;  %v2710_v0 = vor.u32 %v3846_v54, %v2709_v53 }
  0x2b   :  { %499 = vmatpush.bf16.msra.mxu1 %v2750_v22  ;;  %v2839_v63 = vld [vmem:[#allocation2 + $0x1d8] sm:$0xf0]  ;;  %v2838_v1 = vor.u32 %v3878_v58, %v2837_v55  ;;  %v2714_v2 = vor.u32 %v3844_v59, %v2711_v60  ;;  %v2693_v3 = vld [vmem:[#allocation2 + $0xa8] sm:$0xf]  ;;  %v3842_v4 = vld [vmem:[#allocation2 + $0xb4] sm:$0xf0] }
  0x2c   :  { %513 = vmatpush.bf16.msra.mxu2 %v2626_v23  ;;  %v2821_v5 = vld [vmem:[#allocation2 + $0x1a8] sm:$0xf]  ;;  %v2842_v6 = vor.u32 %v3876_v62, %v2839_v63  ;;  %v3874_v7 = vld [vmem:[#allocation2 + $0x1b4] sm:$0xf0]  ;;  %v3840_v8 = vld [vmem:[#allocation2 + $0xac] sm:$0xf]  ;;  %v2694_v12 = vor.u32 %v3842_v4, %v2693_v3 }
  0x2d   :  { %527 = vmatpush.bf16.msra.mxu3 %v2754_v24  ;;  %v2695_v9 = vld [vmem:[#allocation2 + $0xb8] sm:$0xf0]  ;;  %v3872_v10 = vld [vmem:[#allocation2 + $0x1ac] sm:$0xf]  ;;  %v2822_v13 = vor.u32 %v3874_v7, %v2821_v5  ;;  %v2677_v15 = vld [vmem:[#allocation2 + $0x88] sm:$0xf] }
  0x2e   :  { %486 = vmatpush.bf16.msra.mxu0 %v2606_v38  ;;  %v2823_v11 = vld [vmem:[#allocation2 + $0x1b8] sm:$0xf0]  ;;  %v2698_v14 = vor.u32 %v3840_v8, %v2695_v9  ;;  %v3838_v16 = vld [vmem:[#allocation2 + $0x94] sm:$0xf0]  ;;  %v2805_v17 = vld [vmem:[#allocation2 + $0x188] sm:$0xf] }
  0x2f   :  { %500 = vmatpush.bf16.msra.mxu1 %v2734_v43  ;;  %v2826_v18 = vor.u32 %v3872_v10, %v2823_v11  ;;  %v3870_v19 = vld [vmem:[#allocation2 + $0x194] sm:$0xf0]  ;;  %v3836_v20 = vld [vmem:[#allocation2 + $0x8c] sm:$0xf]  ;;  %v2679_v21 = vld [vmem:[#allocation2 + $0x98] sm:$0xf0]  ;;  %v2678_v24 = vor.u32 %v3838_v16, %v2677_v15 }
  0x30   :  { %514 = vmatpush.bf16.msra.mxu2 %v2610_v44  ;;  %v3868_v22 = vld [vmem:[#allocation2 + $0x18c] sm:$0xf]  ;;  %v2807_v23 = vld [vmem:[#allocation2 + $0x198] sm:$0xf0]  ;;  %v2806_v25 = vor.u32 %v3870_v19, %v2805_v17  ;;  %v2682_v26 = vor.u32 %v3836_v20, %v2679_v21  ;;  %v2661_v27 = vld [vmem:[#allocation2 + $0x68] sm:$0xf] }
  0x31   :  { %528 = vmatpush.bf16.msra.mxu3 %v2738_v49  ;;  %487 = vmatmul.bf16.vlgmr.msra.gmra.mxu0 %v4273_v57  ;;  %v3834_v28 = vld [vmem:[#allocation2 + $0x74] sm:$0xf0]  ;;  %v2789_v29 = vld [vmem:[#allocation2 + $0x168] sm:$0xf]  ;;  %v2810_v30 = vor.u32 %v3868_v22, %v2807_v23  ;;  %v3832_v32 = vld [vmem:[#allocation2 + $0x6c] sm:$0xf] }
  0x32   :  { %535 = vmatpush.bf16.msrb.mxu0 %v2726_v50  ;;  %501 = vmatmul.bf16.vlgmr.msra.gmra.mxu1 %v4275_v61  ;;  %v3866_v31 = vld [vmem:[#allocation2 + $0x174] sm:$0xf0]  ;;  %v2663_v33 = vld [vmem:[#allocation2 + $0x78] sm:$0xf0]  ;;  %v3864_v34 = vld [vmem:[#allocation2 + $0x16c] sm:$0xf]  ;;  %v2662_v36 = vor.u32 %v3834_v28, %v2661_v27 }
  0x33   :  { %549 = vmatpush.bf16.msrb.mxu1 %v2854_v51  ;;  %515 = vmatmul.bf16.vlgmr.msra.gmra.mxu2 %v4273_v57  ;;  %v2791_v35 = vld [vmem:[#allocation2 + $0x178] sm:$0xf0]  ;;  %v2790_v37 = vor.u32 %v3866_v31, %v2789_v29  ;;  %v2666_v38 = vor.u32 %v3832_v32, %v2663_v33  ;;  %v2645_v39 = vld [vmem:[#allocation2 + $0x48] sm:$0xf]  ;;  %v3830_v40 = vld [vmem:[#allocation2 + $0x54] sm:$0xf0] }
  0x34   :  { %563 = vmatpush.bf16.msrb.mxu2 %v2730_v52  ;;  %529 = vmatmul.bf16.vlgmr.msra.gmra.mxu3 %v4275_v61  ;;  %v2773_v41 = vld [vmem:[#allocation2 + $0x148] sm:$0xf]  ;;  %v2794_v42 = vor.u32 %v3864_v34, %v2791_v35  ;;  %v3862_v43 = vld [vmem:[#allocation2 + $0x154] sm:$0xf0]  ;;  %v3828_v44 = vld [vmem:[#allocation2 + $0x4c] sm:$0xf]  ;;  %v2646_v48 = vor.u32 %v3830_v40, %v2645_v39 }
  0x35   :  { %577 = vmatpush.bf16.msrb.mxu3 %v2858_v56  ;;  %v2647_v45 = vld [vmem:[#allocation2 + $0x58] sm:$0xf0]  ;;  %v3860_v46 = vld [vmem:[#allocation2 + $0x14c] sm:$0xf]  ;;  %v2629_v49 = vld [vmem:[#allocation2 + $0x28] sm:$0xf]  ;;  %v2774_v50 = vor.u32 %v3862_v43, %v2773_v41 }
  0x36   :  { %536 = vmatpush.bf16.msrb.mxu0 %v2710_v0  ;;  %v2775_v47 = vld [vmem:[#allocation2 + $0x158] sm:$0xf0]  ;;  %v2650_v51 = vor.u32 %v3828_v44, %v2647_v45  ;;  %v3826_v52 = vld [vmem:[#allocation2 + $0x34] sm:$0xf0]  ;;  %v2757_v53 = vld [vmem:[#allocation2 + $0x128] sm:$0xf] }
  0x37   :  { %550 = vmatpush.bf16.msrb.mxu1 %v2838_v1  ;;  %v2778_v54 = vor.u32 %v3860_v46, %v2775_v47  ;;  %v3858_v55 = vld [vmem:[#allocation2 + $0x134] sm:$0xf0]  ;;  %v3824_v56 = vld [vmem:[#allocation2 + $0x2c] sm:$0xf]  ;;  %v2631_v58 = vld [vmem:[#allocation2 + $0x38] sm:$0xf0]  ;;  %v2630_v62 = vor.u32 %v3826_v52, %v2629_v49 }
  0x38   :  { %564 = vmatpush.bf16.msrb.mxu2 %v2714_v2  ;;  %v3856_v59 = vld [vmem:[#allocation2 + $0x12c] sm:$0xf]  ;;  %v2759_v60 = vld [vmem:[#allocation2 + $0x138] sm:$0xf0]  ;;  %v2613_v63 = vld [vmem:[#allocation2 + $0x8] sm:$0xf]  ;;  %v2758_v0 = vor.u32 %v3858_v55, %v2757_v53  ;;  %v2634_v1 = vor.u32 %v3824_v56, %v2631_v58 }
  0x39   :  { %578 = vmatpush.bf16.msrb.mxu3 %v2842_v6  ;;  %v3822_v2 = vld [vmem:[#allocation2 + $0x14] sm:$0xf0]  ;;  %v2741_v3 = vld [vmem:[#allocation2 + $0x108] sm:$0xf]  ;;  %v2762_v5 = vor.u32 %v3856_v59, %v2759_v60  ;;  %v3820_v6 = vld [vmem:[#allocation2 + $0xc] sm:$0xf] }
  0x3a   :  { %537 = vmatpush.bf16.msrb.mxu0 %v2694_v12  ;;  %v3854_v4 = vld [vmem:[#allocation2 + $0x114] sm:$0xf0]  ;;  %v2615_v7 = vld [vmem:[#allocation2 + $0x18] sm:$0xf0]  ;;  %v3852_v8 = vld [vmem:[#allocation2 + $0x10c] sm:$0xf]  ;;  %v2614_v12 = vor.u32 %v3822_v2, %v2613_v63 }
  0x3b   :  { %551 = vmatpush.bf16.msrb.mxu1 %v2822_v13  ;;  %v2743_v9 = vld [vmem:[#allocation2 + $0x118] sm:$0xf0]  ;;  %v3029_v10 = vld [vmem:[#allocation4 + $0x150] sm:$0xf]  ;;  %v3928_v11 = vld [vmem:[#allocation4 + $0x164] sm:$0xf0]  ;;  %v2742_v15 = vor.u32 %v3854_v4, %v2741_v3  ;;  %v2618_v16 = vor.u32 %v3820_v6, %v2615_v7 }
  0x3c   :  { %565 = vmatpush.bf16.msrb.mxu2 %v2698_v14  ;;  %v3221_v13 = vld [vmem:[#allocation4 + $0x2d0] sm:$0xf]  ;;  %v3976_v14 = vld [vmem:[#allocation4 + $0x2e4] sm:$0xf0]  ;;  %v2746_v17 = vor.u32 %v3852_v8, %v2743_v9  ;;  %v3005_v21 = vld [vmem:[#allocation4 + $0x120] sm:$0xf] }
  0x3d   :  { %579 = vmatpush.bf16.msrb.mxu3 %v2826_v18  ;;  %v3030_v18 = vor.u32 %v3928_v11, %v3029_v10  ;;  %v3413_v19 = vld [vmem:[#allocation4 + $0x450] sm:$0xf]  ;;  %v4024_v20 = vld [vmem:[#allocation4 + $0x464] sm:$0xf0]  ;;  %v3922_v22 = vld [vmem:[#allocation4 + $0x134] sm:$0xf0]  ;;  %v3222_v23 = vor.u32 %v3976_v14, %v3221_v13 }
  0x3e   :  { %538 = vmatpush.bf16.msrb.mxu0 %v2678_v24  ;;  %v3197_v24 = vld [vmem:[#allocation4 + $0x2a0] sm:$0xf]  ;;  %v3006_v27 = vor.u32 %v3922_v22, %v3005_v21  ;;  %v4018_v29 = vld [vmem:[#allocation4 + $0x434] sm:$0xf0]  ;;  %v3916_v31 = vld [vmem:[#allocation4 + $0x104] sm:$0xf0] }
  0x3f   :  { %552 = vmatpush.bf16.msrb.mxu1 %v2806_v25  ;;  %v3970_v25 = vld [vmem:[#allocation4 + $0x2b4] sm:$0xf0]  ;;  %v3389_v28 = vld [vmem:[#allocation4 + $0x420] sm:$0xf]  ;;  %v3605_v33 = vld [vmem:[#allocation4 + $0x5d0] sm:$0xf] }
  0x40   :  { %566 = vmatpush.bf16.msrb.mxu2 %v2682_v26  ;;  %v3414_v26 = vor.u32 %v4024_v20, %v3413_v19  ;;  %v3198_v32 = vor.u32 %v3970_v25, %v3197_v24  ;;  %v3173_v34 = vld [vmem:[#allocation4 + $0x270] sm:$0xf]  ;;  %v3964_v35 = vld [vmem:[#allocation4 + $0x284] sm:$0xf0]  ;;  %v2957_v40 = vld [vmem:[#allocation4 + $0xc0] sm:$0xf] }
  0x41   :  { %580 = vmatpush.bf16.msrb.mxu3 %v2810_v30  ;;  %v2981_v30 = vld [vmem:[#allocation4 + $0xf0] sm:$0xf]  ;;  %v3910_v43 = vld [vmem:[#allocation4 + $0xd4] sm:$0xf0]  ;;  %v3174_v44 = vor.u32 %v3964_v35, %v3173_v34  ;;  %v3581_v45 = vld [vmem:[#allocation4 + $0x5a0] sm:$0xf] }
  0x42   :  { %539 = vmatpush.bf16.msrb.mxu0 %v2662_v36  ;;  %v4072_v36 = vld [vmem:[#allocation4 + $0x5e4] sm:$0xf0]  ;;  %v2982_v39 = vor.u32 %v3916_v31, %v2981_v30  ;;  %v3365_v41 = vld [vmem:[#allocation4 + $0x3f0] sm:$0xf]  ;;  %v4066_v46 = vld [vmem:[#allocation4 + $0x5b4] sm:$0xf0] }
  0x43   :  { %553 = vmatpush.bf16.msrb.mxu1 %v2790_v37  ;;  %v3390_v37 = vor.u32 %v4018_v29, %v3389_v28  ;;  %v3958_v47 = vld [vmem:[#allocation4 + $0x254] sm:$0xf0]  ;;  %v3125_v53 = vld [vmem:[#allocation4 + $0x210] sm:$0xf]  ;;  %v2909_v56 = vld [vmem:[#allocation4 + $0x60] sm:$0xf] }
  0x44   :  { %567 = vmatpush.bf16.msrb.mxu2 %v2666_v38  ;;  %v3606_v38 = vor.u32 %v4072_v36, %v3605_v33  ;;  %v3898_v58 = vld [vmem:[#allocation4 + $0x74] sm:$0xf0]  ;;  %v3101_v60 = vld [vmem:[#allocation4 + $0x1e0] sm:$0xf]  ;;  %v3077_v3 = vld [vmem:[#allocation4 + $0x1b0] sm:$0xf] }
  0x45   :  { %581 = vmatpush.bf16.msrb.mxu3 %v2794_v42  ;;  %v4012_v42 = vld [vmem:[#allocation4 + $0x404] sm:$0xf0]  ;;  %v2910_v63 = vor.u32 %v3898_v58, %v2909_v56  ;;  %v2861_v6 = vld [vmem:[#allocation4] sm:$0xf]  ;;  %v3886_v7 = vld [vmem:[#allocation4 + $0x14] sm:$0xf0] }
  0x46   :  { %540 = vmatpush.bf16.msrb.mxu0 %v2646_v48  ;;  %v3582_v48 = vor.u32 %v4066_v46, %v3581_v45  ;;  %v3366_v49 = vor.u32 %v4012_v42, %v3365_v41  ;;  %v3940_v4 = vld [vmem:[#allocation4 + $0x1c4] sm:$0xf0]  ;;  %v3925_v8 = vld [vmem:[#allocation4 + $0x154] sm:$0xf]  ;;  %v3031_v10 = vld [vmem:[#allocation4 + $0x168] sm:$0xf0] }
  0x47   :  { %554 = vmatpush.bf16.msrb.mxu1 %v2774_v50  ;;  %v2933_v50 = vld [vmem:[#allocation4 + $0x90] sm:$0xf]  ;;  %v3078_v9 = vor.u32 %v3940_v4, %v3077_v3  ;;  %v3053_v11 = vld [vmem:[#allocation4 + $0x180] sm:$0xf]  ;;  %v3973_v13 = vld [vmem:[#allocation4 + $0x2d4] sm:$0xf] }
  0x48   :  { %568 = vmatpush.bf16.msrb.mxu2 %v2650_v51  ;;  %v3904_v51 = vld [vmem:[#allocation4 + $0xa4] sm:$0xf0]  ;;  %v3223_v14 = vld [vmem:[#allocation4 + $0x2e8] sm:$0xf0]  ;;  %v3007_v19 = vld [vmem:[#allocation4 + $0x138] sm:$0xf0] }
  0x49   :  { %582 = vmatpush.bf16.msrb.mxu3 %v2778_v54  ;;  %v3952_v54 = vld [vmem:[#allocation4 + $0x224] sm:$0xf0]  ;;  %v2934_v55 = vor.u32 %v3904_v51, %v2933_v50  ;;  %v3226_v20 = vor.u32 %v3973_v13, %v3223_v14  ;;  %v3967_v21 = vld [vmem:[#allocation4 + $0x2a4] sm:$0xf]  ;;  %v3199_v22 = vld [vmem:[#allocation4 + $0x2b8] sm:$0xf0] }
  0x4a   :  { %541 = vmatpush.bf16.msrb.mxu0 %v2630_v62  ;;  %v3126_v59 = vor.u32 %v3952_v54, %v3125_v53  ;;  %v3946_v62 = vld [vmem:[#allocation4 + $0x1f4] sm:$0xf0]  ;;  %v3913_v24 = vld [vmem:[#allocation4 + $0xf4] sm:$0xf]  ;;  %v2983_v25 = vld [vmem:[#allocation4 + $0x108] sm:$0xf0] }
  0x4b   :  { %555 = vmatpush.bf16.msrb.mxu1 %v2758_v0  ;;  %v2885_v0 = vld [vmem:[#allocation4 + $0x30] sm:$0xf]  ;;  %v3102_v2 = vor.u32 %v3946_v62, %v3101_v60  ;;  %v3341_v28 = vld [vmem:[#allocation4 + $0x3c0] sm:$0xf]  ;;  %v4006_v29 = vld [vmem:[#allocation4 + $0x3d4] sm:$0xf0] }
  0x4c   :  { %569 = vmatpush.bf16.msrb.mxu2 %v2634_v1  ;;  %v3892_v1 = vld [vmem:[#allocation4 + $0x44] sm:$0xf0]  ;;  %v3907_v30 = vld [vmem:[#allocation4 + $0xc4] sm:$0xf]  ;;  %v3342_v31 = vor.u32 %v4006_v29, %v3341_v28  ;;  %v3557_v34 = vld [vmem:[#allocation4 + $0x570] sm:$0xf] }
  0x4d   :  { %583 = vmatpush.bf16.msrb.mxu3 %v2762_v5  ;;  %v2886_v5 = vor.u32 %v3892_v1, %v2885_v0  ;;  %v4060_v35 = vld [vmem:[#allocation4 + $0x584] sm:$0xf0]  ;;  %v3961_v36 = vld [vmem:[#allocation4 + $0x274] sm:$0xf]  ;;  %v3533_v46 = vld [vmem:[#allocation4 + $0x540] sm:$0xf] }
  0x4e   :  { %542 = vmatpush.bf16.msrb.mxu0 %v2614_v12  ;;  %v3934_v12 = vld [vmem:[#allocation4 + $0x194] sm:$0xf0]  ;;  %v4000_v41 = vld [vmem:[#allocation4 + $0x3a4] sm:$0xf0]  ;;  %v3901_v42 = vld [vmem:[#allocation4 + $0x94] sm:$0xf] }
  0x4f   :  { %556 = vmatpush.bf16.msrb.mxu1 %v2742_v15  ;;  %v2862_v15 = vor.u32 %v3886_v7, %v2861_v6  ;;  %v3293_v50 = vld [vmem:[#allocation4 + $0x360] sm:$0xf]  ;;  %v3994_v51 = vld [vmem:[#allocation4 + $0x374] sm:$0xf0]  ;;  %v2911_v54 = vld [vmem:[#allocation4 + $0x78] sm:$0xf0] }
  0x50   :  { %570 = vmatpush.bf16.msrb.mxu2 %v2618_v16  ;;  %v3034_v16 = vor.u32 %v3925_v8, %v3031_v10  ;;  %v3294_v53 = vor.u32 %v3994_v51, %v3293_v50  ;;  %v3509_v56 = vld [vmem:[#allocation4 + $0x510] sm:$0xf]  ;;  %v4048_v58 = vld [vmem:[#allocation4 + $0x524] sm:$0xf0]  ;;  %v3127_v62 = vld [vmem:[#allocation4 + $0x228] sm:$0xf0] }
  0x51   :  { %584 = vmatpush.bf16.msrb.mxu3 %v2746_v17  ;;  %543 = vmatmul.bf16.vlgmr.msrb.gmra.mxu0 %v4273_v57  ;;  %v3054_v17 = vor.u32 %v3934_v12, %v3053_v11  ;;  %v3510_v60 = vor.u32 %v4048_v58, %v3509_v56  ;;  %v3269_v0 = vld [vmem:[#allocation4 + $0x330] sm:$0xf]  ;;  %v3988_v1 = vld [vmem:[#allocation4 + $0x344] sm:$0xf0]  ;;  %v2887_v4 = vld [vmem:[#allocation4 + $0x48] sm:$0xf0] }
  0x52   :  { %1769 = vmatpush.bf16.msra.mxu0 %v3030_v18  ;;  %557 = vmatmul.bf16.vlgmr.msrb.gmra.mxu1 %v4275_v61  ;;  %v3919_v18 = vld [vmem:[#allocation4 + $0x124] sm:$0xf]  ;;  %v3270_v3 = vor.u32 %v3988_v1, %v3269_v0  ;;  %v3485_v6 = vld [vmem:[#allocation4 + $0x4e0] sm:$0xf]  ;;  %v4042_v7 = vld [vmem:[#allocation4 + $0x4f4] sm:$0xf0] }
  0x53   :  { %1783 = vmatpush.bf16.msra.mxu1 %v3222_v23  ;;  %571 = vmatmul.bf16.vlgmr.msrb.gmra.mxu2 %v4273_v57  ;;  %v3149_v57 = vld [vmem:[#allocation4 + $0x240] sm:$0xf]  ;;  %v3010_v23 = vor.u32 %v3919_v18, %v3007_v19  ;;  %v3943_v8 = vld [vmem:[#allocation4 + $0x1e4] sm:$0xf]  ;;  %v3103_v10 = vld [vmem:[#allocation4 + $0x1f8] sm:$0xf0] }
  0x54   :  { %585 = vmatmul.bf16.vlgmr.msrb.gmra.mxu3 %v4275_v61  ;;  %1797 = vmatpush.bf16.msra.mxu2 %v3414_v26  ;;  %v2958_v61 = vor.u32 %v3910_v43, %v2957_v40  ;;  %v3150_v52 = vor.u32 %v3958_v47, %v3149_v57  ;;  %v3202_v26 = vor.u32 %v3967_v21, %v3199_v22  ;;  %v3317_v40 = vld [vmem:[#allocation4 + $0x390] sm:$0xf]  ;;  %v4054_v57 = vld [vmem:[#allocation4 + $0x554] sm:$0xf0]  ;;  %v3245_v12 = vld [vmem:[#allocation4 + $0x300] sm:$0xf] }
  0x55   :  { %1811 = vmatpush.bf16.msra.mxu3 %v3606_v38  ;;  %v3175_v38 = vld [vmem:[#allocation4 + $0x288] sm:$0xf0]  ;;  %v3318_v43 = vor.u32 %v4000_v41, %v3317_v40  ;;  %v3534_v47 = vor.u32 %v4054_v57, %v3533_v46  ;;  %v3106_v11 = vor.u32 %v3943_v8, %v3103_v10  ;;  %v3982_v13 = vld [vmem:[#allocation4 + $0x314] sm:$0xf0]  ;;  %v3883_v14 = vld [vmem:[#allocation4 + $0x4] sm:$0xf] }
  0x56   :  { %1770 = vmatpush.bf16.msra.mxu0 %v3006_v27  ;;  %v2986_v27 = vor.u32 %v3913_v24, %v2983_v25  ;;  %v3415_v18 = vld [vmem:[#allocation4 + $0x468] sm:$0xf0]  ;;  %v3461_v21 = vld [vmem:[#allocation4 + $0x4b0] sm:$0xf]  ;;  %v4036_v22 = vld [vmem:[#allocation4 + $0x4c4] sm:$0xf0] }
  0x57   :  { %1784 = vmatpush.bf16.msra.mxu1 %v3198_v32  ;;  %v2959_v32 = vld [vmem:[#allocation4 + $0xd8] sm:$0xf0]  ;;  %v3079_v24 = vld [vmem:[#allocation4 + $0x1c8] sm:$0xf0]  ;;  %v3462_v25 = vor.u32 %v4036_v22, %v3461_v21  ;;  %v4003_v46 = vld [vmem:[#allocation4 + $0x3c4] sm:$0xf] }
  0x58   :  { %1798 = vmatpush.bf16.msra.mxu2 %v3390_v37  ;;  %v2962_v33 = vor.u32 %v3907_v30, %v2959_v32  ;;  %v3558_v37 = vor.u32 %v4060_v35, %v3557_v34  ;;  %v3391_v28 = vld [vmem:[#allocation4 + $0x438] sm:$0xf0]  ;;  %v3437_v30 = vld [vmem:[#allocation4 + $0x480] sm:$0xf]  ;;  %v4069_v35 = vld [vmem:[#allocation4 + $0x5d4] sm:$0xf] }
  0x59   :  { %1812 = vmatpush.bf16.msra.mxu3 %v3582_v48  ;;  %v3955_v48 = vld [vmem:[#allocation4 + $0x244] sm:$0xf]  ;;  %v3055_v34 = vld [vmem:[#allocation4 + $0x198] sm:$0xf0]  ;;  %v3367_v40 = vld [vmem:[#allocation4 + $0x408] sm:$0xf0] }
  0x5a   :  { %1771 = vmatpush.bf16.msra.mxu0 %v2982_v39  ;;  %v3178_v39 = vor.u32 %v3961_v36, %v3175_v38  ;;  %v3343_v57 = vld [vmem:[#allocation4 + $0x3d8] sm:$0xf0]  ;;  %v4051_v56 = vld [vmem:[#allocation4 + $0x544] sm:$0xf]  ;;  %v3271_v10 = vld [vmem:[#allocation4 + $0x348] sm:$0xf0] }
  0x5b   :  { %1785 = vmatpush.bf16.msra.mxu1 %v3174_v44  ;;  %v2935_v44 = vld [vmem:[#allocation4 + $0xa8] sm:$0xf0]  ;;  %v3535_v58 = vld [vmem:[#allocation4 + $0x558] sm:$0xf0]  ;;  %v3979_v22 = vld [vmem:[#allocation4 + $0x304] sm:$0xf] }
  0x5c   :  { %1799 = vmatpush.bf16.msra.mxu2 %v3366_v49  ;;  %v2938_v45 = vor.u32 %v3901_v42, %v2935_v44  ;;  %v3151_v49 = vld [vmem:[#allocation4 + $0x258] sm:$0xf0]  ;;  %v4063_v42 = vld [vmem:[#allocation4 + $0x5a4] sm:$0xf] }
  0x5d   :  { %1813 = vmatpush.bf16.msra.mxu3 %v3558_v37  ;;  %v3607_v37 = vld [vmem:[#allocation4 + $0x5e8] sm:$0xf0] }
  0x5e   :  { %1772 = vmatpush.bf16.msra.mxu0 %v2958_v61  ;;  %v3154_v61 = vor.u32 %v3955_v48, %v3151_v49  ;;  %v3610_v38 = vor.u32 %v4069_v35, %v3607_v37  ;;  %v4057_v48 = vld [vmem:[#allocation4 + $0x574] sm:$0xf]  ;;  %v3559_v49 = vld [vmem:[#allocation4 + $0x588] sm:$0xf0]  ;;  %v3229_v37 = vld [vmem:[#allocation4 + $0x2d8] sm:$0xf] }
  0x5f   :  { %1786 = vmatpush.bf16.msra.mxu1 %v3150_v52  ;;  %v3895_v52 = vld [vmem:[#allocation4 + $0x64] sm:$0xf]  ;;  %v3562_v50 = vor.u32 %v4057_v48, %v3559_v49 }
  0x60   :  { %1800 = vmatpush.bf16.msra.mxu2 %v3342_v31  ;;  %v4030_v31 = vld [vmem:[#allocation4 + $0x494] sm:$0xf0] }
  0x61   :  { %1814 = vmatpush.bf16.msra.mxu3 %v3534_v47  ;;  %v3438_v32 = vor.u32 %v4030_v31, %v3437_v30  ;;  %v3346_v47 = vor.u32 %v4003_v46, %v3343_v57  ;;  %v3923_v31 = vld [vmem:[#allocation4 + $0x13c] sm:$0xf0]  ;;  %v3917_v46 = vld [vmem:[#allocation4 + $0x10c] sm:$0xf0] }
  0x62   :  { %1773 = vmatpush.bf16.msra.mxu0 %v2934_v55  ;;  %v2914_v55 = vor.u32 %v3895_v52, %v2911_v54  ;;  %v3997_v52 = vld [vmem:[#allocation4 + $0x394] sm:$0xf] }
  0x63   :  { %1787 = vmatpush.bf16.msra.mxu1 %v3126_v59  ;;  %v3949_v59 = vld [vmem:[#allocation4 + $0x214] sm:$0xf] }
  0x64   :  { %1801 = vmatpush.bf16.msra.mxu2 %v3318_v43  ;;  %v3583_v43 = vld [vmem:[#allocation4 + $0x5b8] sm:$0xf0] }
  0x65   :  { %1815 = vmatpush.bf16.msra.mxu3 %v3510_v60  ;;  %v3586_v44 = vor.u32 %v4063_v42, %v3583_v43  ;;  %v3538_v60 = vor.u32 %v4051_v56, %v3535_v58  ;;  %v4027_v42 = vld [vmem:[#allocation4 + $0x484] sm:$0xf]  ;;  %v3439_v43 = vld [vmem:[#allocation4 + $0x498] sm:$0xf0]  ;;  %v3181_v56 = vld [vmem:[#allocation4 + $0x278] sm:$0xf] }
  0x66   :  { %1774 = vmatpush.bf16.msra.mxu0 %v2910_v63  ;;  %v3130_v63 = vor.u32 %v3949_v59, %v3127_v62  ;;  %v3991_v62 = vld [vmem:[#allocation4 + $0x364] sm:$0xf]  ;;  %v3442_v57 = vor.u32 %v4027_v42, %v3439_v43  ;;  %v3965_v58 = vld [vmem:[#allocation4 + $0x28c] sm:$0xf0] }
  0x67   :  { %1788 = vmatpush.bf16.msra.mxu1 %v3102_v2  ;;  %v3889_v2 = vld [vmem:[#allocation4 + $0x34] sm:$0xf] }
  0x68   :  { %1802 = vmatpush.bf16.msra.mxu2 %v3294_v53  ;;  %v3319_v53 = vld [vmem:[#allocation4 + $0x3a8] sm:$0xf0] }
  0x6a   :  { %1775 = vmatpush.bf16.msra.mxu0 %v2886_v5  ;;  %v2890_v5 = vor.u32 %v3889_v2, %v2887_v4  ;;  %v4045_v2 = vld [vmem:[#allocation4 + $0x514] sm:$0xf] }
  0x6b   :  { %1789 = vmatpush.bf16.msra.mxu1 %v3078_v9  ;;  %v3486_v9 = vor.u32 %v4042_v7, %v3485_v6 }
  0x6c   :  { %1803 = vmatpush.bf16.msra.mxu2 %v3270_v3  ;;  %v3511_v3 = vld [vmem:[#allocation4 + $0x528] sm:$0xf0] }
  0x6d   :  { %1816 = vmatpush.bf16.msra.mxu3 %v3486_v9  ;;  %v3514_v6 = vor.u32 %v4045_v2, %v3511_v3  ;;  %v3985_v9 = vld [vmem:[#allocation4 + $0x334] sm:$0xf]  ;;  %v3157_v3 = vld [vmem:[#allocation4 + $0x248] sm:$0xf] }
  0x6e   :  { %1776 = vmatpush.bf16.msra.mxu0 %v2862_v15  ;;  %v3246_v15 = vor.u32 %v3982_v13, %v3245_v12  ;;  %v3274_v13 = vor.u32 %v3985_v9, %v3271_v10  ;;  %v3133_v10 = vld [vmem:[#allocation4 + $0x218] sm:$0xf] }
  0x6f   :  { %1790 = vmatpush.bf16.msra.mxu1 %v3054_v17  ;;  %v4021_v17 = vld [vmem:[#allocation4 + $0x454] sm:$0xf] }
  0x70   :  { %1804 = vmatpush.bf16.msra.mxu2 %v3246_v15  ;;  %v4039_v15 = vld [vmem:[#allocation4 + $0x4e4] sm:$0xf] }
  0x71   :  { %1817 = vmatpush.bf16.msra.mxu3 %v3462_v25 }
  0x72   :  { %1825 = vmatpush.bf16.msrb.mxu0 %v3034_v16  ;;  %v2863_v16 = vld [vmem:[#allocation4 + $0x18] sm:$0xf0] }
  0x73   :  { %1839 = vmatpush.bf16.msrb.mxu1 %v3226_v20  ;;  %v2866_v19 = vor.u32 %v3883_v14, %v2863_v16  ;;  %v3418_v20 = vor.u32 %v4021_v17, %v3415_v18  ;;  %v3487_v16 = vld [vmem:[#allocation4 + $0x4f8] sm:$0xf0] }
  0x74   :  { %v3490_v21 = vor.u32 %v4039_v15, %v3487_v16 }
  0x75   :  { %1853 = vmatpush.bf16.msrb.mxu2 %v3418_v20  ;;  %1818 = vmatpush.bf16.msra.mxu3 %v3438_v32  ;;  %v3929_v20 = vld [vmem:[#allocation4 + $0x16c] sm:$0xf0]  ;;  %v4033_v32 = vld [vmem:[#allocation4 + $0x4b4] sm:$0xf] }
  0x76   :  { %1826 = vmatpush.bf16.msrb.mxu0 %v3010_v23  ;;  %v3937_v23 = vld [vmem:[#allocation4 + $0x1b4] sm:$0xf] }
  0x77   :  { %1840 = vmatpush.bf16.msrb.mxu1 %v3202_v26  ;;  %v3082_v26 = vor.u32 %v3937_v23, %v3079_v24  ;;  %v3247_v23 = vld [vmem:[#allocation4 + $0x318] sm:$0xf0] }
  0x78   :  { %v3250_v25 = vor.u32 %v3979_v22, %v3247_v23  ;;  %v3109_v22 = vld [vmem:[#allocation4 + $0x1e8] sm:$0xf]  ;;  %v3947_v23 = vld [vmem:[#allocation4 + $0x1fc] sm:$0xf0] }
  0x79   :  { %1867 = vmatpush.bf16.msrb.mxu3 %v3610_v38  ;;  %v3977_v38 = vld [vmem:[#allocation4 + $0x2ec] sm:$0xf0] }
  0x7a   :  { %1827 = vmatpush.bf16.msrb.mxu0 %v2986_v27  ;;  %v4015_v27 = vld [vmem:[#allocation4 + $0x424] sm:$0xf]  ;;  %v3230_v48 = vor.u32 %v3977_v38, %v3229_v37  ;;  %v3085_v37 = vld [vmem:[#allocation4 + $0x1b8] sm:$0xf]  ;;  %v3941_v38 = vld [vmem:[#allocation4 + $0x1cc] sm:$0xf0] }
  0x7b   :  { %1841 = vmatpush.bf16.msrb.mxu1 %v3178_v39  ;;  %v3394_v29 = vor.u32 %v4015_v27, %v3391_v28  ;;  %v4009_v39 = vld [vmem:[#allocation4 + $0x3f4] sm:$0xf]  ;;  %v3013_v28 = vld [vmem:[#allocation4 + $0x128] sm:$0xf] }
  0x7c   :  { %v3370_v41 = vor.u32 %v4009_v39, %v3367_v40 }
  0x7d   :  { %1854 = vmatpush.bf16.msrb.mxu2 %v3394_v29  ;;  %1868 = vmatpush.bf16.msrb.mxu3 %v3586_v44  ;;  %v2989_v44 = vld [vmem:[#allocation4 + $0xf8] sm:$0xf] }
  0x7e   :  { %1828 = vmatpush.bf16.msrb.mxu0 %v2962_v33  ;;  %v3931_v33 = vld [vmem:[#allocation4 + $0x184] sm:$0xf] }
  0x7f   :  { %1842 = vmatpush.bf16.msrb.mxu1 %v3154_v61  ;;  %v3058_v36 = vor.u32 %v3931_v33, %v3055_v34  ;;  %v3463_v33 = vld [vmem:[#allocation4 + $0x4c8] sm:$0xf0] }
  0x81   :  { %1855 = vmatpush.bf16.msrb.mxu2 %v3370_v41  ;;  %1869 = vmatpush.bf16.msrb.mxu3 %v3562_v50  ;;  %v3014_v41 = vor.u32 %v3923_v31, %v3013_v28  ;;  %v3205_v50 = vld [vmem:[#allocation4 + $0x2a8] sm:$0xf]  ;;  %v3926_v31 = vld [vmem:[#allocation4 + $0x15c] sm:$0xf] }
  0x82   :  { %1829 = vmatpush.bf16.msrb.mxu0 %v2938_v45  ;;  %v4288_v45 = vld [vmem:[%s4348_s2] sm:$0xf] }
  0x83   :  { %1843 = vmatpush.bf16.msrb.mxu1 %v3130_v63  ;;  %v151_v61 = vperm.slane %v4288_v45, 0  ;;  %v3295_v63 = vld [vmem:[#allocation4 + $0x378] sm:$0xf0]  ;;  %v152_v1 = vperm.slane %v4288_v45, 1  ;;  %v154_v15 = vperm.slane %v4288_v45, 3 }
  0x84   :  { %v3298_v0 = vor.u32 %v3991_v62, %v3295_v63  ;;  %v3182_v63 = vor.u32 %v3965_v58, %v3181_v56 }
  0x85   :  { %1856 = vmatpush.bf16.msrb.mxu2 %v3346_v47  ;;  %1870 = vmatpush.bf16.msrb.mxu3 %v3538_v60  ;;  %v3905_v60 = vld [vmem:[#allocation4 + $0xac] sm:$0xf0] }
  0x86   :  { %1830 = vmatpush.bf16.msrb.mxu0 %v2914_v55  ;;  %v3322_v55 = vor.u32 %v3997_v52, %v3319_v53  ;;  %v2965_v52 = vld [vmem:[#allocation4 + $0xc8] sm:$0xf]  ;;  %v3911_v53 = vld [vmem:[#allocation4 + $0xdc] sm:$0xf0] }
  0x87   :  { %1844 = vmatpush.bf16.msrb.mxu1 %v3106_v11 }
  0x89   :  { %1857 = vmatpush.bf16.msrb.mxu2 %v3322_v55  ;;  %1871 = vmatpush.bf16.msrb.mxu3 %v3514_v6  ;;  %v2966_v55 = vor.u32 %v3911_v53, %v2965_v52  ;;  %v3899_v6 = vld [vmem:[#allocation4 + $0x7c] sm:$0xf0]  ;;  %v3613_v53 = vld [vmem:[#allocation4 + $0x5d8] sm:$0xf] }
  0x8a   :  { %1831 = vmatpush.bf16.msrb.mxu0 %v2890_v5  ;;  %v3935_v52 = vld [vmem:[#allocation4 + $0x19c] sm:$0xf0] }
  0x8b   :  { %1845 = vmatpush.bf16.msrb.mxu1 %v3082_v26 }
  0x8d   :  { %1858 = vmatpush.bf16.msrb.mxu2 %v3298_v0  ;;  %1872 = vmatpush.bf16.msrb.mxu3 %v3490_v21  ;;  %v153_v0 = vperm.slane %v4288_v45, 2  ;;  %v3039_v45 = vld [vmem:[#allocation4 + $0x170] sm:$0xf0] }
  0x8e   :  { %1832 = vmatpush.bf16.msrb.mxu0 %v2866_v19  ;;  %v3037_v19 = vld [vmem:[#allocation4 + $0x158] sm:$0xf] }
  0x8f   :  { %1846 = vmatpush.bf16.msrb.mxu1 %v3058_v36  ;;  %v3038_v27 = vor.u32 %v3929_v20, %v3037_v19  ;;  %v3466_v36 = vor.u32 %v4033_v32, %v3463_v33  ;;  %v3110_v33 = vor.u32 %v3947_v23, %v3109_v22  ;;  %v4061_v23 = vld [vmem:[#allocation4 + $0x58c] sm:$0xf0] }
  0x91   :  { %1859 = vmatpush.bf16.msrb.mxu2 %v3274_v13  ;;  %1873 = vmatpush.bf16.msrb.mxu3 %v3466_v36  ;;  %v3893_v13 = vld [vmem:[#allocation4 + $0x4c] sm:$0xf0] }
  0x95   :  { %1860 = vmatpush.bf16.msrb.mxu2 %v3250_v25  ;;  %1874 = vmatpush.bf16.msrb.mxu3 %v3442_v57  ;;  %v2869_v25 = vld [vmem:[#allocation4 + $0x8] sm:$0xf]  ;;  %v3015_v57 = vld [vmem:[#allocation4 + $0x140] sm:$0xf0] }
  0xae   :  { %v488_v51 = vpop.f32.mrf.mxu0 }
  0xaf   :  { %v502_v54 = vpop.f32.mrf.mxu1  ;;  %v489_v59 = vadd.f32 %v488_v51, %v151_v61  ;;  %v3971_v51 = vld [vmem:[#allocation4 + $0x2bc] sm:$0xf0] }
  0xb1   :  { %v503_v4 = vadd.f32 %v502_v54, %v489_v59  ;;  %v3206_v54 = vor.u32 %v3971_v51, %v3205_v50  ;;  %v2941_v59 = vld [vmem:[#allocation4 + $0x98] sm:$0xf]  ;;  %v3061_v50 = vld [vmem:[#allocation4 + $0x188] sm:$0xf] }
  0xb2   :  { %v2942_v2 = vor.u32 %v3905_v60, %v2941_v59  ;;  %v3974_v59 = vld [vmem:[#allocation4 + $0x2dc] sm:$0xf]  ;;  %v3231_v60 = vld [vmem:[#allocation4 + $0x2f0] sm:$0xf0] }
  0xb3   :  { %v591_v17 = vmax.f32 %v503_v4, 0.0  ;;  %v3959_v4 = vld [vmem:[#allocation4 + $0x25c] sm:$0xf0] }
  0xb6   :  { %v516_v5 = vpop.f32.mrf.mxu2  ;;  %v490_v7 = vpop.f32.mrf.mxu0 }
  0xb7   :  { %v530_v8 = vpop.f32.mrf.mxu3  ;;  %v491_v11 = vadd.f32 %v490_v7, %v151_v61  ;;  %v504_v12 = vpop.f32.mrf.mxu1  ;;  %v517_v14 = vadd.f32 %v516_v5, %v152_v1  ;;  %v2990_v61 = vor.u32 %v3917_v46, %v2989_v44  ;;  %v2917_v5 = vld [vmem:[#allocation4 + $0x68] sm:$0xf]  ;;  %v3158_v7 = vor.u32 %v3959_v4, %v3157_v3  ;;  %v4019_v44 = vld [vmem:[#allocation4 + $0x43c] sm:$0xf0]  ;;  %v3920_v46 = vld [vmem:[#allocation4 + $0x12c] sm:$0xf] }
  0xb8   :  { %v2918_v9 = vor.u32 %v3899_v6, %v2917_v5  ;;  %v3018_v58 = vor.u32 %v3920_v46, %v3015_v57  ;;  %v3062_v4 = vor.u32 %v3935_v52, %v3061_v50  ;;  %v3234_v6 = vor.u32 %v3974_v59, %v3231_v60  ;;  %v3517_v46 = vld [vmem:[#allocation4 + $0x518] sm:$0xf]  ;;  %v2895_v52 = vld [vmem:[#allocation4 + $0x50] sm:$0xf0]  ;;  %v4043_v60 = vld [vmem:[#allocation4 + $0x4fc] sm:$0xf0] }
  0xb9   :  { %v505_v18 = vadd.f32 %v504_v12, %v491_v11  ;;  %v531_v26 = vadd.f32 %v530_v8, %v517_v14  ;;  %v3953_v11 = vld [vmem:[#allocation4 + $0x22c] sm:$0xf0]  ;;  %v2893_v12 = vld [vmem:[#allocation4 + $0x38] sm:$0xf] }
  0xba   :  { %v2894_v21 = vor.u32 %v3893_v13, %v2893_v12  ;;  %v3968_v12 = vld [vmem:[#allocation4 + $0x2ac] sm:$0xf]  ;;  %v3207_v13 = vld [vmem:[#allocation4 + $0x2c0] sm:$0xf0] }
  0xbb   :  { %v595_v24 = vmax.f32 %v505_v18, 0.0  ;;  %v592_v39 = vmax.f32 %v531_v26, 0.0  ;;  %v3134_v18 = vor.u32 %v3953_v11, %v3133_v10  ;;  %v3887_v26 = vld [vmem:[#allocation4 + $0x1c] sm:$0xf0] }
  0xbc   :  { %v2870_v36 = vor.u32 %v3887_v26, %v2869_v25  ;;  %v3183_v25 = vld [vmem:[#allocation4 + $0x290] sm:$0xf0]  ;;  %v3902_v26 = vld [vmem:[#allocation4 + $0x9c] sm:$0xf] }
  0xbd   :  { %v4292_v29 = vpack.c.bf16 %v595_v24, %v591_v17 }
  0xbe   :  { %v518_v30 = vpop.f32.mrf.mxu2 }
  0xbf   :  { %v519_v34 = vadd.f32 %v518_v30, %v152_v1  ;;  %v532_v35 = vpop.f32.mrf.mxu3  ;;  %1777 = vmatmul.bf16.vlgmr.msra.gmra.mxu0 %v4292_v29  ;;  %v4025_v30 = vld [vmem:[#allocation4 + $0x46c] sm:$0xf0] }
  0xc0   :  { %1881 = vmatpush.bf16.msra.mxu0 %v3038_v27  ;;  %v3421_v27 = vld [vmem:[#allocation4 + $0x458] sm:$0xf] }
  0xc1   :  { %v533_v40 = vadd.f32 %v532_v35, %v519_v34 }
  0xc3   :  { %v596_v47 = vmax.f32 %v533_v40, 0.0  ;;  %v3042_v40 = vor.u32 %v3926_v31, %v3039_v45 }
  0xc4   :  { %1882 = vmatpush.bf16.msra.mxu0 %v3014_v41  ;;  %v3397_v41 = vld [vmem:[#allocation4 + $0x428] sm:$0xf] }
  0xc5   :  { %v4295_v49 = vpack.c.bf16 %v596_v47, %v592_v39  ;;  %v3422_v39 = vor.u32 %v4025_v30, %v3421_v27  ;;  %v3398_v56 = vor.u32 %v4019_v44, %v3397_v41  ;;  %v2943_v27 = vld [vmem:[#allocation4 + $0xb0] sm:$0xf0]  ;;  %v4001_v30 = vld [vmem:[#allocation4 + $0x3ac] sm:$0xf0]  ;;  %v3995_v41 = vld [vmem:[#allocation4 + $0x37c] sm:$0xf0] }
  0xc7   :  { %1791 = vmatmul.bf16.vlgmr.msra.gmra.mxu1 %v4295_v49 }
  0xc8   :  { %1895 = vmatpush.bf16.msra.mxu1 %v3230_v48  ;;  %1883 = vmatpush.bf16.msra.mxu0 %v2990_v61  ;;  %v3086_v61 = vor.u32 %v3941_v38, %v3085_v37  ;;  %v3896_v38 = vld [vmem:[#allocation4 + $0x6c] sm:$0xf] }
  0xcc   :  { %1896 = vmatpush.bf16.msra.mxu1 %v3206_v54  ;;  %1884 = vmatpush.bf16.msra.mxu0 %v2966_v55  ;;  %v4073_v54 = vld [vmem:[#allocation4 + $0x5ec] sm:$0xf0] }
  0xcd   :  { %v3614_v5 = vor.u32 %v4073_v54, %v3613_v53  ;;  %v3277_v53 = vld [vmem:[#allocation4 + $0x338] sm:$0xf]  ;;  %v3989_v54 = vld [vmem:[#allocation4 + $0x34c] sm:$0xf0] }
  0xce   :  { %v544_v62 = vpop.f32.mrf.mxu0 }
  0xcf   :  { %v558_v1 = vpop.f32.mrf.mxu1  ;;  %1833 = vmatmul.bf16.vlgmr.msrb.gmra.mxu0 %v4292_v29  ;;  %v545_v8 = vadd.f32 %v544_v62, %v153_v0  ;;  %v3373_v62 = vld [vmem:[#allocation4 + $0x3f8] sm:$0xf] }
  0xd0   :  { %1897 = vmatpush.bf16.msra.mxu1 %v3182_v63  ;;  %1885 = vmatpush.bf16.msra.mxu0 %v2942_v2  ;;  %v4013_v63 = vld [vmem:[#allocation4 + $0x40c] sm:$0xf0] }
  0xd1   :  { %v559_v19 = vadd.f32 %v558_v1, %v545_v8  ;;  %v2991_v1 = vld [vmem:[#allocation4 + $0x110] sm:$0xf0]  ;;  %v4067_v8 = vld [vmem:[#allocation4 + $0x5bc] sm:$0xf0]  ;;  %v3374_v10 = vor.u32 %v4013_v63, %v3373_v62  ;;  %v3944_v62 = vld [vmem:[#allocation4 + $0x1ec] sm:$0xf] }
  0xd2   :  { %v3111_v63 = vld [vmem:[#allocation4 + $0x200] sm:$0xf0] }
  0xd3   :  { %v593_v34 = vmax.f32 %v559_v19, 0.0  ;;  %v3210_v19 = vor.u32 %v3968_v12, %v3207_v13  ;;  %v3469_v12 = vld [vmem:[#allocation4 + $0x4b8] sm:$0xf] }
  0xd4   :  { %1898 = vmatpush.bf16.msra.mxu1 %v3158_v7  ;;  %1886 = vmatpush.bf16.msra.mxu0 %v2918_v9  ;;  %v3589_v7 = vld [vmem:[#allocation4 + $0x5a8] sm:$0xf] }
  0xd6   :  { %v572_v14 = vpop.f32.mrf.mxu2  ;;  %v546_v17 = vpop.f32.mrf.mxu0 }
  0xd7   :  { %v586_v16 = vpop.f32.mrf.mxu3  ;;  %v547_v20 = vadd.f32 %v546_v17, %v153_v0  ;;  %v560_v24 = vpop.f32.mrf.mxu1  ;;  %1847 = vmatmul.bf16.vlgmr.msrb.gmra.mxu1 %v4295_v49  ;;  %v573_v32 = vadd.f32 %v572_v14, %v154_v15  ;;  %v3914_v0 = vld [vmem:[#allocation4 + $0xfc] sm:$0xf]  ;;  %v3349_v14 = vld [vmem:[#allocation4 + $0x3c8] sm:$0xf]  ;;  %v2967_v17 = vld [vmem:[#allocation4 + $0xe0] sm:$0xf0] }
  0xd8   :  { %1899 = vmatpush.bf16.msra.mxu1 %v3134_v18  ;;  %1887 = vmatpush.bf16.msra.mxu0 %v2894_v21  ;;  %v2994_v11 = vor.u32 %v3914_v0, %v2991_v1  ;;  %v3590_v18 = vor.u32 %v4067_v8, %v3589_v7  ;;  %v3278_v0 = vor.u32 %v3989_v54, %v3277_v53  ;;  %v3253_v1 = vld [vmem:[#allocation4 + $0x308] sm:$0xf]  ;;  %v4004_v53 = vld [vmem:[#allocation4 + $0x3cc] sm:$0xf]  ;;  %v3351_v54 = vld [vmem:[#allocation4 + $0x3e0] sm:$0xf0] }
  0xd9   :  { %v561_v28 = vadd.f32 %v560_v24, %v547_v20  ;;  %v587_v47 = vadd.f32 %v586_v16, %v573_v32  ;;  %v3908_v16 = vld [vmem:[#allocation4 + $0xcc] sm:$0xf]  ;;  %v3565_v20 = vld [vmem:[#allocation4 + $0x578] sm:$0xf]  ;;  %v3962_v24 = vld [vmem:[#allocation4 + $0x27c] sm:$0xf]  ;;  %v3114_v8 = vor.u32 %v3944_v62, %v3111_v63 }
  0xda   :  { %v2970_v22 = vor.u32 %v3908_v16, %v2967_v17  ;;  %v3566_v31 = vor.u32 %v4061_v23, %v3565_v20  ;;  %v3186_v45 = vor.u32 %v3962_v24, %v3183_v25  ;;  %v3541_v32 = vld [vmem:[#allocation4 + $0x548] sm:$0xf]  ;;  %v3087_v16 = vld [vmem:[#allocation4 + $0x1d0] sm:$0xf0]  ;;  %v4016_v20 = vld [vmem:[#allocation4 + $0x42c] sm:$0xf] }
  0xdb   :  { %v597_v35 = vmax.f32 %v561_v28, 0.0  ;;  %v594_v2 = vmax.f32 %v587_v47, 0.0  ;;  %v3325_v28 = vld [vmem:[#allocation4 + $0x398] sm:$0xf]  ;;  %v4049_v47 = vld [vmem:[#allocation4 + $0x52c] sm:$0xf0] }
  0xdc   :  { %1900 = vmatpush.bf16.msra.mxu1 %v3110_v33  ;;  %1888 = vmatpush.bf16.msra.mxu0 %v2870_v36  ;;  %v2946_v33 = vor.u32 %v3902_v26, %v2943_v27  ;;  %v3159_v36 = vld [vmem:[#allocation4 + $0x260] sm:$0xf0]  ;;  %v3326_v37 = vor.u32 %v4001_v30, %v3325_v28  ;;  %v3445_v26 = vld [vmem:[#allocation4 + $0x488] sm:$0xf]  ;;  %v4031_v27 = vld [vmem:[#allocation4 + $0x49c] sm:$0xf0] }
  0xdd   :  { %v4302_v42 = vpack.c.bf16 %v597_v35, %v593_v34  ;;  %v4055_v34 = vld [vmem:[#allocation4 + $0x55c] sm:$0xf0]  ;;  %v3956_v35 = vld [vmem:[#allocation4 + $0x24c] sm:$0xf]  ;;  %v3399_v25 = vld [vmem:[#allocation4 + $0x440] sm:$0xf0] }
  0xde   :  { %v574_v43 = vpop.f32.mrf.mxu2  ;;  %v3162_v44 = vor.u32 %v3956_v35, %v3159_v36  ;;  %v3932_v28 = vld [vmem:[#allocation4 + $0x18c] sm:$0xf]  ;;  %v3063_v30 = vld [vmem:[#allocation4 + $0x1a0] sm:$0xf0]  ;;  %v3402_v35 = vor.u32 %v4016_v20, %v3399_v25  ;;  %v2997_v36 = vld [vmem:[#allocation4 + $0x100] sm:$0xf] }
  0xdf   :  { %v575_v48 = vadd.f32 %v574_v43, %v154_v15  ;;  %v588_v51 = vpop.f32.mrf.mxu3  ;;  %1805 = vmatmul.bf16.vlgmr.msra.gmra.mxu2 %v4302_v42  ;;  %1889 = vmatmul.bf16.vlgmr.msra.gmra.mxu0 %v4292_v29  ;;  %v4007_v15 = vld [vmem:[#allocation4 + $0x3dc] sm:$0xf0]  ;;  %v3542_v43 = vor.u32 %v4055_v34, %v3541_v32  ;;  %v3615_v32 = vld [vmem:[#allocation4 + $0x5f0] sm:$0xf0]  ;;  %v3978_v34 = vld [vmem:[#allocation4 + $0x2f4] sm:$0xf0] }
  0xe0   :  { %1909 = vmatpush.bf16.msra.mxu2 %v3422_v39  ;;  %1937 = vmatpush.bf16.msrb.mxu0 %v3042_v40  ;;  %v3350_v21 = vor.u32 %v4007_v15, %v3349_v14  ;;  %v2919_v39 = vld [vmem:[#allocation4 + $0x80] sm:$0xf0]  ;;  %v3301_v40 = vld [vmem:[#allocation4 + $0x368] sm:$0xf]  ;;  %v4037_v14 = vld [vmem:[#allocation4 + $0x4cc] sm:$0xf0] }
  0xe1   :  { %v589_v55 = vadd.f32 %v588_v51, %v575_v48  ;;  %1901 = vmatpush.bf16.msra.mxu1 %v3086_v61  ;;  %v2922_v57 = vor.u32 %v3896_v38, %v2919_v39  ;;  %v3950_v48 = vld [vmem:[#allocation4 + $0x21c] sm:$0xf]  ;;  %v3135_v61 = vld [vmem:[#allocation4 + $0x230] sm:$0xf0]  ;;  %v3302_v50 = vor.u32 %v3995_v41, %v3301_v40  ;;  %v3470_v23 = vor.u32 %v4037_v14, %v3469_v12  ;;  %v3189_v62 = vld [vmem:[#allocation4 + $0x280] sm:$0xf] }
  0xe2   :  { %v3890_v51 = vld [vmem:[#allocation4 + $0x3c] sm:$0xf]  ;;  %v3446_v38 = vor.u32 %v4031_v27, %v3445_v26  ;;  %v3066_v39 = vor.u32 %v3932_v28, %v3063_v30  ;;  %v3375_v41 = vld [vmem:[#allocation4 + $0x410] sm:$0xf0]  ;;  %v3966_v63 = vld [vmem:[#allocation4 + $0x294] sm:$0xf0] }
  0xe3   :  { %v598_v3 = vmax.f32 %v589_v55, 0.0  ;;  %v3518_v55 = vor.u32 %v4049_v47, %v3517_v46  ;;  %v2898_v59 = vor.u32 %v3890_v51, %v2895_v52  ;;  %v3938_v15 = vld [vmem:[#allocation4 + $0x1bc] sm:$0xf]  ;;  %v4064_v46 = vld [vmem:[#allocation4 + $0x5ac] sm:$0xf] }
  0xe4   :  { %1910 = vmatpush.bf16.msra.mxu2 %v3398_v56  ;;  %1938 = vmatpush.bf16.msrb.mxu0 %v3018_v58  ;;  %v3138_v56 = vor.u32 %v3950_v48, %v3135_v61  ;;  %v3493_v58 = vld [vmem:[#allocation4 + $0x4e8] sm:$0xf]  ;;  %v3090_v24 = vor.u32 %v3938_v15, %v3087_v16  ;;  %v4010_v40 = vld [vmem:[#allocation4 + $0x3fc] sm:$0xf]  ;;  %v3591_v47 = vld [vmem:[#allocation4 + $0x5c0] sm:$0xf0] }
  0xe5   :  { %v4306_v9 = vpack.c.bf16 %v598_v3, %v594_v2  ;;  %1902 = vmatpush.bf16.msra.mxu1 %v3062_v4  ;;  %v3884_v2 = vld [vmem:[#allocation4 + $0xc] sm:$0xf]  ;;  %v2871_v3 = vld [vmem:[#allocation4 + $0x20] sm:$0xf0]  ;;  %v3983_v4 = vld [vmem:[#allocation4 + $0x31c] sm:$0xf0]  ;;  %v3494_v7 = vor.u32 %v4043_v60, %v3493_v58 }
  0xe6   :  { %v2874_v13 = vor.u32 %v3884_v2, %v2871_v3  ;;  %v3254_v17 = vor.u32 %v3983_v4, %v3253_v1  ;;  %v3213_v48 = vld [vmem:[#allocation4 + $0x2b0] sm:$0xf]  ;;  %v3972_v61 = vld [vmem:[#allocation4 + $0x2c4] sm:$0xf0]  ;;  %v4058_v58 = vld [vmem:[#allocation4 + $0x57c] sm:$0xf] }
  0xe7   :  { %1819 = vmatmul.bf16.vlgmr.msra.gmra.mxu3 %v4306_v9  ;;  %v2973_v51 = vld [vmem:[#allocation4 + $0xd0] sm:$0xf]  ;;  %v3912_v52 = vld [vmem:[#allocation4 + $0xe4] sm:$0xf0]  ;;  %v3567_v60 = vld [vmem:[#allocation4 + $0x590] sm:$0xf0] }
  0xe8   :  { %1923 = vmatpush.bf16.msra.mxu3 %v3614_v5  ;;  %1911 = vmatpush.bf16.msra.mxu2 %v3374_v10  ;;  %v3045_v5 = vld [vmem:[#allocation4 + $0x160] sm:$0xf]  ;;  %v4022_v10 = vld [vmem:[#allocation4 + $0x45c] sm:$0xf]  ;;  %v3906_v2 = vld [vmem:[#allocation4 + $0xb4] sm:$0xf0] }
  0xe9   :  { %1951 = vmatpush.bf16.msrb.mxu1 %v3234_v6  ;;  %1939 = vmatpush.bf16.msrb.mxu0 %v2994_v11  ;;  %v3930_v6 = vld [vmem:[#allocation4 + $0x174] sm:$0xf0]  ;;  %v3423_v11 = vld [vmem:[#allocation4 + $0x470] sm:$0xf0]  ;;  %v2949_v1 = vld [vmem:[#allocation4 + $0xa0] sm:$0xf] }
  0xea   :  { %1903 = vmatmul.bf16.vlgmr.msra.gmra.mxu1 %v4295_v49  ;;  %v3998_v3 = vld [vmem:[#allocation4 + $0x39c] sm:$0xf]  ;;  %v3327_v4 = vld [vmem:[#allocation4 + $0x3b0] sm:$0xf0]  ;;  %v3960_v12 = vld [vmem:[#allocation4 + $0x264] sm:$0xf0] }
  0xeb   :  { %v2925_v14 = vld [vmem:[#allocation4 + $0x70] sm:$0xf]  ;;  %v3900_v15 = vld [vmem:[#allocation4 + $0x84] sm:$0xf0]  ;;  %v3992_v16 = vld [vmem:[#allocation4 + $0x36c] sm:$0xf] }
  0xec   :  { %1924 = vmatpush.bf16.msra.mxu3 %v3590_v18  ;;  %1912 = vmatpush.bf16.msra.mxu2 %v3350_v21  ;;  %v3046_v18 = vor.u32 %v3930_v6, %v3045_v5  ;;  %v3021_v21 = vld [vmem:[#allocation4 + $0x130] sm:$0xf]  ;;  %v3570_v5 = vor.u32 %v4058_v58, %v3567_v60  ;;  %v3190_v6 = vor.u32 %v3966_v63, %v3189_v62  ;;  %v4046_v20 = vld [vmem:[#allocation4 + $0x51c] sm:$0xf]  ;;  %v2901_v26 = vld [vmem:[#allocation4 + $0x40] sm:$0xf] }
  0xed   :  { %1952 = vmatpush.bf16.msrb.mxu1 %v3210_v19  ;;  %1940 = vmatpush.bf16.msrb.mxu0 %v2970_v22  ;;  %v3426_v19 = vor.u32 %v4022_v10, %v3423_v11  ;;  %v3924_v22 = vld [vmem:[#allocation4 + $0x144] sm:$0xf0]  ;;  %v3543_v10 = vld [vmem:[#allocation4 + $0x560] sm:$0xf0]  ;;  %v3165_v11 = vld [vmem:[#allocation4 + $0x250] sm:$0xf] }
  0xee   :  { %v3894_v27 = vld [vmem:[#allocation4 + $0x54] sm:$0xf0]  ;;  %v3986_v28 = vld [vmem:[#allocation4 + $0x33c] sm:$0xf]  ;;  %v3279_v30 = vld [vmem:[#allocation4 + $0x350] sm:$0xf0] }
  0xef   :  { %1861 = vmatmul.bf16.vlgmr.msrb.gmra.mxu2 %v4302_v42  ;;  %v3405_v58 = vld [vmem:[#allocation4 + $0x430] sm:$0xf]  ;;  %v3023_v60 = vld [vmem:[#allocation4 + $0x148] sm:$0xf0] }
  0xf0   :  { %1925 = vmatpush.bf16.msra.mxu3 %v3566_v31  ;;  %1913 = vmatpush.bf16.msra.mxu2 %v3326_v37  ;;  %v4070_v31 = vld [vmem:[#allocation4 + $0x5dc] sm:$0xf]  ;;  %v3918_v37 = vld [vmem:[#allocation4 + $0x114] sm:$0xf0] }
  0xf1   :  { %1953 = vmatpush.bf16.msrb.mxu1 %v3186_v45  ;;  %1941 = vmatpush.bf16.msrb.mxu0 %v2946_v33  ;;  %v3022_v45 = vor.u32 %v3924_v22, %v3021_v21  ;;  %v3237_v33 = vld [vmem:[#allocation4 + $0x2e0] sm:$0xf]  ;;  %v2926_v21 = vor.u32 %v3900_v15, %v2925_v14  ;;  %v3519_v22 = vld [vmem:[#allocation4 + $0x530] sm:$0xf0] }
  0xf4   :  { %1926 = vmatpush.bf16.msra.mxu3 %v3542_v43  ;;  %1914 = vmatpush.bf16.msra.mxu2 %v3302_v50  ;;  %v3618_v43 = vor.u32 %v4070_v31, %v3615_v32  ;;  %v3378_v50 = vor.u32 %v4010_v40, %v3375_v41  ;;  %v3522_v31 = vor.u32 %v4046_v20, %v3519_v22  ;;  %v4040_v32 = vld [vmem:[#allocation4 + $0x4ec] sm:$0xf]  ;;  %v3888_v40 = vld [vmem:[#allocation4 + $0x24] sm:$0xf0]  ;;  %v3255_v41 = vld [vmem:[#allocation4 + $0x320] sm:$0xf0] }
  0xf5   :  { %1954 = vmatpush.bf16.msrb.mxu1 %v3162_v44  ;;  %1942 = vmatpush.bf16.msrb.mxu0 %v2922_v57  ;;  %v3238_v44 = vor.u32 %v3978_v34, %v3237_v33  ;;  %v2998_v57 = vor.u32 %v3918_v37, %v2997_v36  ;;  %v2902_v33 = vor.u32 %v3894_v27, %v2901_v26  ;;  %v3495_v34 = vld [vmem:[#allocation4 + $0x500] sm:$0xf0]  ;;  %v3948_v36 = vld [vmem:[#allocation4 + $0x204] sm:$0xf0]  ;;  %v3597_v20 = vld [vmem:[#allocation4 + $0x5b0] sm:$0xf] }
  0xf6   :  { %v3282_v37 = vor.u32 %v3986_v28, %v3279_v30  ;;  %v4068_v22 = vld [vmem:[#allocation4 + $0x5c4] sm:$0xf0]  ;;  %v2975_v26 = vld [vmem:[#allocation4 + $0xe8] sm:$0xf0] }
  0xf7   :  { %1875 = vmatmul.bf16.vlgmr.msrb.gmra.mxu3 %v4306_v9  ;;  %v3598_v28 = vor.u32 %v4068_v22, %v3597_v20  ;;  %v4023_v20 = vld [vmem:[#allocation4 + $0x464] sm:$0xf]  ;;  %v3431_v22 = vld [vmem:[#allocation4 + $0x478] sm:$0xf0] }
  0xf8   :  { %1927 = vmatpush.bf16.msra.mxu3 %v3518_v55  ;;  %1915 = vmatpush.bf16.msra.mxu2 %v3278_v0  ;;  %v3594_v55 = vor.u32 %v4064_v46, %v3591_v47  ;;  %v3354_v0 = vor.u32 %v4004_v53, %v3351_v54  ;;  %v3498_v46 = vor.u32 %v4040_v32, %v3495_v34  ;;  %v3429_v47 = vld [vmem:[#allocation4 + $0x460] sm:$0xf]  ;;  %v3942_v53 = vld [vmem:[#allocation4 + $0x1d4] sm:$0xf0] }
  0xf9   :  { %1955 = vmatpush.bf16.msrb.mxu1 %v3138_v56  ;;  %1943 = vmatpush.bf16.msrb.mxu0 %v2898_v59  ;;  %v3214_v56 = vor.u32 %v3972_v61, %v3213_v48  ;;  %v2974_v59 = vor.u32 %v3912_v52, %v2973_v51  ;;  %v4026_v48 = vld [vmem:[#allocation4 + $0x474] sm:$0xf0]  ;;  %v4034_v61 = vld [vmem:[#allocation4 + $0x4bc] sm:$0xf]  ;;  %v3471_v51 = vld [vmem:[#allocation4 + $0x4d0] sm:$0xf0] }
  0xfa   :  { %v3093_v52 = vld [vmem:[#allocation4 + $0x1c0] sm:$0xf]  ;;  %v3474_v62 = vor.u32 %v4034_v61, %v3471_v51  ;;  %v4062_v34 = vld [vmem:[#allocation4 + $0x594] sm:$0xf0]  ;;  %v3167_v61 = vld [vmem:[#allocation4 + $0x268] sm:$0xf0] }
  0xfb   :  { %v3094_v63 = vor.u32 %v3942_v53, %v3093_v52  ;;  %v3573_v32 = vld [vmem:[#allocation4 + $0x580] sm:$0xf]  ;;  %v2927_v51 = vld [vmem:[#allocation4 + $0x88] sm:$0xf0] }
  0xfc   :  { %1928 = vmatpush.bf16.msra.mxu3 %v3494_v7  ;;  %1916 = vmatpush.bf16.msra.mxu2 %v3254_v17  ;;  %v4052_v7 = vld [vmem:[#allocation4 + $0x54c] sm:$0xf]  ;;  %v3303_v17 = vld [vmem:[#allocation4 + $0x380] sm:$0xf0] }
  0xfd   :  { %1956 = vmatpush.bf16.msrb.mxu1 %v3114_v8  ;;  %1944 = vmatpush.bf16.msrb.mxu0 %v2874_v13  ;;  %v2950_v8 = vor.u32 %v3906_v2, %v2949_v1  ;;  %v3330_v13 = vor.u32 %v3998_v3, %v3327_v4  ;;  %v3306_v25 = vor.u32 %v3992_v16, %v3303_v17  ;;  %v4028_v1 = vld [vmem:[#allocation4 + $0x48c] sm:$0xf]  ;;  %v3447_v2 = vld [vmem:[#allocation4 + $0x4a0] sm:$0xf0]  ;;  %v3069_v3 = vld [vmem:[#allocation4 + $0x190] sm:$0xf] }
  0xfe   :  { %v3936_v4 = vld [vmem:[#allocation4 + $0x1a4] sm:$0xf0]  ;;  %v3450_v14 = vor.u32 %v4028_v1, %v3447_v2  ;;  %v2903_v1 = vld [vmem:[#allocation4 + $0x58] sm:$0xf0] }
  0xff   :  { %1917 = vmatmul.bf16.vlgmr.msra.gmra.mxu2 %v4302_v42  ;;  %v3070_v15 = vor.u32 %v3936_v4, %v3069_v3 }
 0x100   :  { %1965 = vmatpush.bf16.msrb.mxu2 %v3426_v19  ;;  %1929 = vmatpush.bf16.msra.mxu3 %v3470_v23  ;;  %v3166_v19 = vor.u32 %v3960_v12, %v3165_v11  ;;  %v3141_v23 = vld [vmem:[#allocation4 + $0x220] sm:$0xf]  ;;  %v3915_v12 = vld [vmem:[#allocation4 + $0x104] sm:$0xf] }
 0x101   :  { %1993 = vmatpush.bf16.msra.mxu0 %v3046_v18  ;;  %1957 = vmatpush.bf16.msrb.mxu1 %v3090_v24  ;;  %v3546_v18 = vor.u32 %v4052_v7, %v3543_v10  ;;  %v3954_v24 = vld [vmem:[#allocation4 + $0x234] sm:$0xf0]  ;;  %v3239_v10 = vld [vmem:[#allocation4 + $0x2f8] sm:$0xf0] }
 0x102   :  { %1945 = vmatmul.bf16.vlgmr.msrb.gmra.mxu0 %v4292_v29  ;;  %v4074_v7 = vld [vmem:[#allocation4 + $0x5f4] sm:$0xf0] }
 0x104   :  { %1966 = vmatpush.bf16.msrb.mxu2 %v3402_v35  ;;  %1930 = vmatpush.bf16.msra.mxu3 %v3446_v38  ;;  %v3117_v35 = vld [vmem:[#allocation4 + $0x1f0] sm:$0xf]  ;;  %v3980_v38 = vld [vmem:[#allocation4 + $0x30c] sm:$0xf] }
 0x105   :  { %1994 = vmatpush.bf16.msra.mxu0 %v3022_v45  ;;  %1958 = vmatpush.bf16.msrb.mxu1 %v3066_v39  ;;  %v3142_v45 = vor.u32 %v3954_v24, %v3141_v23  ;;  %v2877_v39 = vld [vmem:[#allocation4 + $0x10] sm:$0xf]  ;;  %v3258_v54 = vor.u32 %v3980_v38, %v3255_v41  ;;  %v3969_v23 = vld [vmem:[#allocation4 + $0x2b4] sm:$0xf]  ;;  %v3215_v24 = vld [vmem:[#allocation4 + $0x2c8] sm:$0xf0] }
 0x106   :  { %v3218_v30 = vor.u32 %v3969_v23, %v3215_v24  ;;  %v2951_v38 = vld [vmem:[#allocation4 + $0xb8] sm:$0xf0]  ;;  %v3477_v23 = vld [vmem:[#allocation4 + $0x4c0] sm:$0xf]  ;;  %v4038_v24 = vld [vmem:[#allocation4 + $0x4d4] sm:$0xf0] }
 0x107   :  { %1931 = vmatmul.bf16.vlgmr.msra.gmra.mxu3 %v4306_v9 }
 0x108   :  { %1979 = vmatpush.bf16.msrb.mxu3 %v3618_v43  ;;  %1959 = vmatmul.bf16.vlgmr.msrb.gmra.mxu1 %v4295_v49  ;;  %v3927_v43 = vld [vmem:[#allocation4 + $0x164] sm:$0xf] }
 0x109   :  { %2007 = vmatpush.bf16.msra.mxu1 %v3238_v44  ;;  %1995 = vmatpush.bf16.msra.mxu0 %v2998_v57  ;;  %v3047_v44 = vld [vmem:[#allocation4 + $0x178] sm:$0xf0]  ;;  %v3118_v57 = vor.u32 %v3948_v36, %v3117_v35  ;;  %v3963_v35 = vld [vmem:[#allocation4 + $0x284] sm:$0xf] }
 0x10a   :  { %1967 = vmatpush.bf16.msrb.mxu2 %v3378_v50  ;;  %v2878_v50 = vor.u32 %v3888_v40, %v2877_v39  ;;  %v3191_v36 = vld [vmem:[#allocation4 + $0x298] sm:$0xf0]  ;;  %v3574_v40 = vor.u32 %v4062_v34, %v3573_v32  ;;  %v4032_v34 = vld [vmem:[#allocation4 + $0x4a4] sm:$0xf0] }
 0x10b   :  { %v3194_v41 = vor.u32 %v3963_v35, %v3191_v36  ;;  %v3933_v35 = vld [vmem:[#allocation4 + $0x194] sm:$0xf]  ;;  %v3071_v36 = vld [vmem:[#allocation4 + $0x1a8] sm:$0xf0] }
 0x10c   :  { %1980 = vmatpush.bf16.msrb.mxu3 %v3594_v55  ;;  %v3050_v55 = vor.u32 %v3927_v43, %v3047_v44  ;;  %v3333_v43 = vld [vmem:[#allocation4 + $0x3a0] sm:$0xf]  ;;  %v4002_v44 = vld [vmem:[#allocation4 + $0x3b4] sm:$0xf0] }
 0x10d   :  { %2008 = vmatpush.bf16.msra.mxu1 %v3214_v56  ;;  %1996 = vmatpush.bf16.msra.mxu0 %v2974_v59  ;;  %v3430_v56 = vor.u32 %v4026_v48, %v3429_v47  ;;  %v3921_v59 = vld [vmem:[#allocation4 + $0x134] sm:$0xf]  ;;  %v4056_v47 = vld [vmem:[#allocation4 + $0x564] sm:$0xf0]  ;;  %v3334_v52 = vor.u32 %v4002_v44, %v3333_v43  ;;  %v3074_v43 = vor.u32 %v3933_v35, %v3071_v36 }
 0x10e   :  { %1968 = vmatpush.bf16.msrb.mxu2 %v3354_v0  ;;  %v4020_v0 = vld [vmem:[#allocation4 + $0x444] sm:$0xf0]  ;;  %v3957_v48 = vld [vmem:[#allocation4 + $0x254] sm:$0xf] }
 0x10f   :  { %v3406_v11 = vor.u32 %v4020_v0, %v3405_v58  ;;  %v3525_v58 = vld [vmem:[#allocation4 + $0x520] sm:$0xf]  ;;  %v3891_v0 = vld [vmem:[#allocation4 + $0x44] sm:$0xf]  ;;  %v4085_v36 = vld [vmem:[#allocation6 + $0x50] sm:$0xff] }
 0x110   :  { %1981 = vmatpush.bf16.msrb.mxu3 %v3570_v5  ;;  %v3621_v5 = vld [vmem:[#allocation4 + $0x5e0] sm:$0xf] }
 0x111   :  { %2009 = vmatpush.bf16.msra.mxu1 %v3190_v6  ;;  %1997 = vmatpush.bf16.msra.mxu0 %v2950_v8  ;;  %v3026_v6 = vor.u32 %v3921_v59, %v3023_v60  ;;  %v3975_v8 = vld [vmem:[#allocation4 + $0x2e4] sm:$0xf]  ;;  %v3622_v16 = vor.u32 %v4074_v7, %v3621_v5  ;;  %v4050_v60 = vld [vmem:[#allocation4 + $0x534] sm:$0xf0]  ;;  %v3285_v5 = vld [vmem:[#allocation4 + $0x340] sm:$0xf] }
 0x112   :  { %1969 = vmatpush.bf16.msrb.mxu2 %v3330_v13  ;;  %v2999_v13 = vld [vmem:[#allocation4 + $0x118] sm:$0xf0]  ;;  %v3242_v17 = vor.u32 %v3975_v8, %v3239_v10  ;;  %v3526_v3 = vor.u32 %v4050_v60, %v3525_v58  ;;  %v3501_v7 = vld [vmem:[#allocation4 + $0x4f0] sm:$0xf]  ;;  %v2906_v8 = vor.u32 %v3891_v0, %v2903_v1  ;;  %v4044_v10 = vld [vmem:[#allocation4 + $0x504] sm:$0xf0] }
 0x113   :  { %v3335_v60 = vld [vmem:[#allocation4 + $0x3b8] sm:$0xf0]  ;;  %v4079_v0 = vld [vmem:[#allocation6 + $0x20] sm:$0xff] }
 0x114   :  { %1982 = vmatpush.bf16.msrb.mxu3 %v3546_v18  ;;  %v3381_v18 = vld [vmem:[#allocation4 + $0x400] sm:$0xf] }
 0x115   :  { %2010 = vmatpush.bf16.msra.mxu1 %v3166_v19  ;;  %1998 = vmatpush.bf16.msra.mxu0 %v2926_v21  ;;  %v4014_v19 = vld [vmem:[#allocation4 + $0x414] sm:$0xf0]  ;;  %v3002_v21 = vor.u32 %v3915_v12, %v2999_v13  ;;  %v3119_v12 = vld [vmem:[#allocation4 + $0x208] sm:$0xf0]  ;;  %v3885_v13 = vld [vmem:[#allocation4 + $0x14] sm:$0xf] }
 0x116   :  { %1970 = vmatpush.bf16.msrb.mxu2 %v3306_v25  ;;  %v3909_v25 = vld [vmem:[#allocation4 + $0xd4] sm:$0xf]  ;;  %v3382_v27 = vor.u32 %v4014_v19, %v3381_v18  ;;  %v3261_v18 = vld [vmem:[#allocation4 + $0x310] sm:$0xf]  ;;  %v3984_v19 = vld [vmem:[#allocation4 + $0x324] sm:$0xf0] }
 0x118   :  { %1983 = vmatpush.bf16.msrb.mxu3 %v3522_v31  ;;  %v3357_v31 = vld [vmem:[#allocation4 + $0x3d0] sm:$0xf] }
 0x119   :  { %2011 = vmatpush.bf16.msra.mxu1 %v3142_v45  ;;  %1999 = vmatpush.bf16.msra.mxu0 %v2902_v33  ;;  %v4008_v45 = vld [vmem:[#allocation4 + $0x3e4] sm:$0xf0]  ;;  %v2978_v33 = vor.u32 %v3909_v25, %v2975_v26  ;;  %v3939_v25 = vld [vmem:[#allocation4 + $0x1c4] sm:$0xf]  ;;  %v3095_v26 = vld [vmem:[#allocation4 + $0x1d8] sm:$0xf0] }
 0x11a   :  { %1971 = vmatpush.bf16.msrb.mxu2 %v3282_v37  ;;  %v3903_v37 = vld [vmem:[#allocation4 + $0xa4] sm:$0xf]  ;;  %v3358_v39 = vor.u32 %v4008_v45, %v3357_v31  ;;  %v4017_v31 = vld [vmem:[#allocation4 + $0x434] sm:$0xf]  ;;  %v3407_v45 = vld [vmem:[#allocation4 + $0x448] sm:$0xf0]  ;;  %v3098_v32 = vor.u32 %v3939_v25, %v3095_v26 }
 0x11b   :  { %v4088_v25 = vld [vmem:[#allocation6 + $0x68] sm:$0xff] }
 0x11c   :  { %1984 = vmatpush.bf16.msrb.mxu3 %v3498_v46  ;;  %v3549_v46 = vld [vmem:[#allocation4 + $0x550] sm:$0xf] }
 0x11d   :  { %2012 = vmatpush.bf16.msra.mxu1 %v3118_v57  ;;  %2000 = vmatpush.bf16.msra.mxu0 %v2878_v50  ;;  %v2954_v57 = vor.u32 %v3903_v37, %v2951_v38  ;;  %v3897_v50 = vld [vmem:[#allocation4 + $0x74] sm:$0xf]  ;;  %v3550_v53 = vor.u32 %v4056_v47, %v3549_v46  ;;  %v4071_v37 = vld [vmem:[#allocation4 + $0x5e4] sm:$0xf]  ;;  %v3623_v38 = vld [vmem:[#allocation4 + $0x5f8] sm:$0xf0] }
 0x11e   :  { %1972 = vmatpush.bf16.msrb.mxu2 %v3258_v54  ;;  %v3170_v54 = vor.u32 %v3957_v48, %v3167_v61  ;;  %v2930_v59 = vor.u32 %v3897_v50, %v2927_v51  ;;  %v3626_v44 = vor.u32 %v4071_v37, %v3623_v38  ;;  %v4011_v46 = vld [vmem:[#allocation4 + $0x404] sm:$0xf]  ;;  %v4065_v47 = vld [vmem:[#allocation4 + $0x5b4] sm:$0xf]  ;;  %v3599_v48 = vld [vmem:[#allocation4 + $0x5c8] sm:$0xf0] }
 0x11f   :  { %v4081_v50 = vld [vmem:[#allocation6 + $0x30] sm:$0xff]  ;;  %v3602_v51 = vor.u32 %v4065_v47, %v3599_v48  ;;  %v4329_v38 = vld [vmem:[%s4350_s4] sm:$0x3f]  ;;  %v4094_v48 = vld [vmem:[#allocation6 + $0x98] sm:$0xff] }
 0x120   :  { %1985 = vmatpush.bf16.msrb.mxu3 %v3474_v62  ;;  %2001 = vmatmul.bf16.vlgmr.msra.gmra.mxu0 %v4292_v29  ;;  %v3951_v62 = vld [vmem:[#allocation4 + $0x224] sm:$0xf]  ;;  %v4097_v37 = vld [vmem:[#allocation6 + $0xb0] sm:$0xff] }
 0x121   :  { %2049 = vmatpush.bf16.msrb.mxu0 %v3050_v55  ;;  %2013 = vmatpush.bf16.msra.mxu1 %v3094_v63  ;;  %v3309_v55 = vld [vmem:[#allocation4 + $0x370] sm:$0xf]  ;;  %v3143_v63 = vld [vmem:[#allocation4 + $0x238] sm:$0xf0] }
 0x122   :  { %2021 = vmatpush.bf16.msra.mxu2 %v3430_v56  ;;  %v3996_v56 = vld [vmem:[#allocation4 + $0x384] sm:$0xf0]  ;;  %v3146_v4 = vor.u32 %v3951_v62, %v3143_v63  ;;  %v4053_v62 = vld [vmem:[#allocation4 + $0x554] sm:$0xf]  ;;  %v3551_v63 = vld [vmem:[#allocation4 + $0x568] sm:$0xf0] }
 0x123   :  { %1973 = vmatmul.bf16.vlgmr.msrb.gmra.mxu2 %v4302_v42  ;;  %v3310_v2 = vor.u32 %v3996_v56, %v3309_v55  ;;  %v4080_v55 = vld [vmem:[#allocation6 + $0x28] sm:$0xff] }
 0x124   :  { %1986 = vmatpush.bf16.msrb.mxu3 %v3450_v14  ;;  %v2879_v14 = vld [vmem:[#allocation4 + $0x28] sm:$0xf0] }
 0x125   :  { %2050 = vmatpush.bf16.msrb.mxu0 %v3026_v6  ;;  %2014 = vmatpush.bf16.msra.mxu1 %v3070_v15  ;;  %v3990_v6 = vld [vmem:[#allocation4 + $0x354] sm:$0xf0] }
 0x126   :  { %2022 = vmatpush.bf16.msra.mxu2 %v3406_v11  ;;  %v3945_v11 = vld [vmem:[#allocation4 + $0x1f4] sm:$0xf]  ;;  %v3286_v15 = vor.u32 %v3990_v6, %v3285_v5  ;;  %v4047_v5 = vld [vmem:[#allocation4 + $0x524] sm:$0xf]  ;;  %v3527_v6 = vld [vmem:[#allocation4 + $0x538] sm:$0xf0] }
 0x127   :  { %1987 = vmatmul.bf16.vlgmr.msrb.gmra.mxu3 %v4306_v9 }
 0x128   :  { %2035 = vmatpush.bf16.msra.mxu3 %v3622_v16  ;;  %2015 = vmatmul.bf16.vlgmr.msra.gmra.mxu1 %v4295_v49  ;;  %v3502_v16 = vor.u32 %v4044_v10, %v3501_v7  ;;  %v4078_v7 = vld [vmem:[#allocation6 + $0x18] sm:$0xff]  ;;  %v3530_v10 = vor.u32 %v4047_v5, %v3527_v6 }
 0x129   :  { %2063 = vmatpush.bf16.msrb.mxu1 %v3242_v17  ;;  %2051 = vmatpush.bf16.msrb.mxu0 %v3002_v21  ;;  %v3122_v17 = vor.u32 %v3945_v11, %v3119_v12  ;;  %v2882_v21 = vor.u32 %v3885_v13, %v2879_v14  ;;  %v3987_v11 = vld [vmem:[#allocation4 + $0x344] sm:$0xf]  ;;  %v3287_v12 = vld [vmem:[#allocation4 + $0x358] sm:$0xf0]  ;;  %v4041_v13 = vld [vmem:[#allocation4 + $0x4f4] sm:$0xf] }
 0x12a   :  { %2023 = vmatpush.bf16.msra.mxu2 %v3382_v27  ;;  %v3262_v27 = vor.u32 %v3984_v19, %v3261_v18  ;;  %v3503_v14 = vld [vmem:[#allocation4 + $0x508] sm:$0xf0]  ;;  %v3981_v19 = vld [vmem:[#allocation4 + $0x314] sm:$0xf] }
 0x12b   :  { %v3506_v18 = vor.u32 %v4041_v13, %v3503_v14 }
 0x12c   :  { %2036 = vmatpush.bf16.msra.mxu3 %v3598_v28  ;;  %v3434_v28 = vor.u32 %v4023_v20, %v3431_v22  ;;  %v3263_v20 = vld [vmem:[#allocation4 + $0x328] sm:$0xf0]  ;;  %v3479_v22 = vld [vmem:[#allocation4 + $0x4d8] sm:$0xf0] }
 0x12d   :  { %2064 = vmatpush.bf16.msrb.mxu1 %v3218_v30  ;;  %2052 = vmatpush.bf16.msrb.mxu0 %v2978_v33  ;;  %v3478_v30 = vor.u32 %v4038_v24, %v3477_v23  ;;  %v3453_v33 = vld [vmem:[#allocation4 + $0x490] sm:$0xf]  ;;  %v3266_v23 = vor.u32 %v3981_v19, %v3263_v20  ;;  %v4076_v24 = vld [vmem:[#allocation6 + $0x8] sm:$0xff] }
 0x12e   :  { %2024 = vmatpush.bf16.msra.mxu2 %v3358_v39  ;;  %v3410_v39 = vor.u32 %v4017_v31, %v3407_v45  ;;  %v4087_v31 = vld [vmem:[#allocation6 + $0x60] sm:$0xff] }
 0x130   :  { %2037 = vmatpush.bf16.msra.mxu3 %v3574_v40  ;;  %v3454_v40 = vor.u32 %v4032_v34, %v3453_v33  ;;  %v4086_v33 = vld [vmem:[#allocation6 + $0x58] sm:$0xff] }
 0x131   :  { %2065 = vmatpush.bf16.msrb.mxu1 %v3194_v41  ;;  %2053 = vmatpush.bf16.msrb.mxu0 %v2954_v57  ;;  %v4082_v41 = vld [vmem:[#allocation6 + $0x38] sm:$0xff] }
 0x132   :  { %2025 = vmatpush.bf16.msra.mxu2 %v3334_v52  ;;  %v3383_v57 = vld [vmem:[#allocation4 + $0x418] sm:$0xf0]  ;;  %v4005_v52 = vld [vmem:[#allocation4 + $0x3d4] sm:$0xf] }
 0x133   :  { %v3386_v61 = vor.u32 %v4011_v46, %v3383_v57  ;;  %v4098_v34 = vld [vmem:[#allocation6 + $0xb8] sm:$0xff]  ;;  %v4083_v46 = vld [vmem:[#allocation6 + $0x40] sm:$0xff] }
 0x134   :  { %2038 = vmatpush.bf16.msra.mxu3 %v3550_v53  ;;  %v3359_v53 = vld [vmem:[#allocation4 + $0x3e8] sm:$0xf0] }
 0x135   :  { %2066 = vmatpush.bf16.msrb.mxu1 %v3170_v54  ;;  %2054 = vmatpush.bf16.msrb.mxu0 %v2930_v59  ;;  %v4059_v54 = vld [vmem:[#allocation4 + $0x584] sm:$0xf]  ;;  %v3362_v56 = vor.u32 %v4005_v52, %v3359_v53  ;;  %v4093_v53 = vld [vmem:[#allocation6 + $0x90] sm:$0xff] }
 0x136   :  { %2026 = vmatpush.bf16.msra.mxu2 %v3310_v2  ;;  %v3999_v59 = vld [vmem:[#allocation4 + $0x3a4] sm:$0xf]  ;;  %v3554_v2 = vor.u32 %v4053_v62, %v3551_v63 }
 0x137   :  { %v3338_v1 = vor.u32 %v3999_v59, %v3335_v60  ;;  %v4092_v60 = vld [vmem:[#allocation6 + $0x88] sm:$0xff] }
 0x138   :  { %2039 = vmatpush.bf16.msra.mxu3 %v3526_v3  ;;  %v3993_v3 = vld [vmem:[#allocation4 + $0x374] sm:$0xf] }
 0x139   :  { %2067 = vmatpush.bf16.msrb.mxu1 %v3146_v4  ;;  %2055 = vmatpush.bf16.msrb.mxu0 %v2906_v8  ;;  %v3311_v4 = vld [vmem:[#allocation4 + $0x388] sm:$0xf0]  ;;  %v4090_v8 = vld [vmem:[#allocation6 + $0x78] sm:$0xff] }
 0x13a   :  { %2027 = vmatpush.bf16.msra.mxu2 %v3286_v15  ;;  %v4077_v15 = vld [vmem:[#allocation6 + $0x10] sm:$0xff] }
 0x13c   :  { %2040 = vmatpush.bf16.msra.mxu3 %v3502_v16  ;;  %v4089_v16 = vld [vmem:[#allocation6 + $0x70] sm:$0xff] }
 0x13d   :  { %2068 = vmatpush.bf16.msrb.mxu1 %v3122_v17  ;;  %2056 = vmatpush.bf16.msrb.mxu0 %v2882_v21  ;;  %v3290_v17 = vor.u32 %v3987_v11, %v3287_v12  ;;  %v4035_v21 = vld [vmem:[#allocation4 + $0x4c4] sm:$0xf]  ;;  %v4104_v12 = vld [vmem:[#allocation6 + $0xe8] sm:$0xff] }
 0x13e   :  { %2028 = vmatpush.bf16.msra.mxu2 %v3262_v27  ;;  %v3482_v26 = vor.u32 %v4035_v21, %v3479_v22  ;;  %v4029_v27 = vld [vmem:[#allocation4 + $0x494] sm:$0xf]  ;;  %v4103_v21 = vld [vmem:[#allocation6 + $0xe0] sm:$0xff] }
 0x140   :  { %2041 = vmatpush.bf16.msra.mxu3 %v3478_v30  ;;  %2057 = vmatmul.bf16.vlgmr.msrb.gmra.mxu0 %v4292_v29  ;;  %v3575_v29 = vld [vmem:[#allocation4 + $0x598] sm:$0xf0]  ;;  %v4075_v30 = vld [vmem:[#allocation6] sm:$0xff] }
 0x141   :  { %2069 = vmatpush.bf16.msrb.mxu1 %v3098_v32  ;;  %2029 = vmatmul.bf16.vlgmr.msra.gmra.mxu2 %v4302_v42  ;;  %v3578_v58 = vor.u32 %v4059_v54, %v3575_v29  ;;  %v1778_v32 = vpop.f32.mrf.mxu0 }
 0x142   :  { %2077 = vmatpush.bf16.msrb.mxu2 %v3434_v28  ;;  %2511 = vmatpush.bf16.msra.mxu0 %v4082_v41  ;;  %v3455_v28 = vld [vmem:[#allocation4 + $0x4a8] sm:$0xf0] }
 0x143   :  { %v3458_v45 = vor.u32 %v4029_v27, %v3455_v28  ;;  %v4102_v27 = vld [vmem:[#allocation6 + $0xd8] sm:$0xff] }
 0x144   :  { %2042 = vmatpush.bf16.msra.mxu3 %v3454_v40  ;;  %v1792_v35 = vpop.f32.mrf.mxu1  ;;  %v4096_v40 = vld [vmem:[#allocation6 + $0xa8] sm:$0xff] }
 0x145   :  { %2070 = vmatpush.bf16.msrb.mxu1 %v3074_v43  ;;  %v797_v43 = vperm.slane %v4329_v38, 0 }
 0x146   :  { %2078 = vmatpush.bf16.msrb.mxu2 %v3410_v39  ;;  %2512 = vmatpush.bf16.msra.mxu0 %v4081_v50  ;;  %v4084_v39 = vld [vmem:[#allocation6 + $0x48] sm:$0xff] }
 0x147   :  { %2043 = vmatmul.bf16.vlgmr.msra.gmra.mxu3 %v4306_v9  ;;  %v1779_v57 = vadd.f32 %v1778_v32, %v797_v43 }
 0x148   :  { %2091 = vmatpush.bf16.msrb.mxu3 %v3626_v44  ;;  %2071 = vmatmul.bf16.vlgmr.msrb.gmra.mxu1 %v4295_v49  ;;  %v3314_v49 = vor.u32 %v3993_v3, %v3311_v4  ;;  %v4106_v3 = vld [vmem:[#allocation6 + $0xf8] sm:$0xff]  ;;  %v798_v4 = vperm.slane %v4329_v38, 1 }
 0x149   :  { %2525 = vmatpush.bf16.msra.mxu1 %v4090_v8  ;;  %v1793_v50 = vadd.f32 %v1792_v35, %v1779_v57  ;;  %v4105_v8 = vld [vmem:[#allocation6 + $0xf0] sm:$0xff] }
 0x14a   :  { %2079 = vmatpush.bf16.msrb.mxu2 %v3386_v61  ;;  %2513 = vmatpush.bf16.msra.mxu0 %v4080_v55 }
 0x14c   :  { %2092 = vmatpush.bf16.msrb.mxu3 %v3602_v51  ;;  %v1794_v44 = vpop.f32.mrf.mxu1 }
 0x14d   :  { %2526 = vmatpush.bf16.msra.mxu1 %v4089_v16 }
 0x14e   :  { %2080 = vmatpush.bf16.msrb.mxu2 %v3362_v56  ;;  %2514 = vmatpush.bf16.msra.mxu0 %v4079_v0 }
 0x150   :  { %2093 = vmatpush.bf16.msrb.mxu3 %v3578_v58 }
 0x151   :  { %2527 = vmatpush.bf16.msra.mxu1 %v4088_v25 }
 0x152   :  { %2081 = vmatpush.bf16.msrb.mxu2 %v3338_v1  ;;  %2515 = vmatpush.bf16.msra.mxu0 %v4078_v7 }
 0x154   :  { %2094 = vmatpush.bf16.msrb.mxu3 %v3554_v2  ;;  %v1848_v29 = vpop.f32.mrf.mxu1  ;;  %v4091_v2 = vld [vmem:[#allocation6 + $0x80] sm:$0xff] }
 0x155   :  { %2528 = vmatpush.bf16.msra.mxu1 %v4087_v31  ;;  %v4101_v31 = vld [vmem:[#allocation6 + $0xd0] sm:$0xff] }
 0x156   :  { %2082 = vmatpush.bf16.msrb.mxu2 %v3314_v49  ;;  %2516 = vmatpush.bf16.msra.mxu0 %v4077_v15 }
 0x158   :  { %2095 = vmatpush.bf16.msrb.mxu3 %v3530_v10 }
 0x159   :  { %2529 = vmatpush.bf16.msra.mxu1 %v4086_v33 }
 0x15a   :  { %2083 = vmatpush.bf16.msrb.mxu2 %v3290_v17  ;;  %2517 = vmatpush.bf16.msra.mxu0 %v4076_v24 }
 0x15c   :  { %2096 = vmatpush.bf16.msrb.mxu3 %v3506_v18  ;;  %v1850_v49 = vpop.f32.mrf.mxu1 }
 0x15d   :  { %2530 = vmatpush.bf16.msra.mxu1 %v4085_v36 }
 0x15e   :  { %2084 = vmatpush.bf16.msrb.mxu2 %v3266_v23  ;;  %2518 = vmatpush.bf16.msra.mxu0 %v4075_v30  ;;  %v799_v30 = vperm.slane %v4329_v38, 2 }
 0x160   :  { %2097 = vmatpush.bf16.msrb.mxu3 %v3482_v26 }
 0x161   :  { %2085 = vmatmul.bf16.vlgmr.msrb.gmra.mxu2 %v4302_v42  ;;  %v1780_v42 = vpop.f32.mrf.mxu0  ;;  %2531 = vmatpush.bf16.msra.mxu1 %v4084_v39 }
 0x162   :  { %2539 = vmatpush.bf16.msra.mxu2 %v4098_v34  ;;  %v1806_v41 = vpop.f32.mrf.mxu2  ;;  %v1781_v51 = vadd.f32 %v1780_v42, %v797_v43 }
 0x163   :  { %v1807_v55 = vadd.f32 %v1806_v41, %v1793_v50 }
 0x164   :  { %2098 = vmatpush.bf16.msrb.mxu3 %v3458_v45  ;;  %v1795_v54 = vadd.f32 %v1794_v44, %v1781_v51  ;;  %v4099_v44 = vld [vmem:[#allocation6 + $0xc0] sm:$0xff]  ;;  %v4112_v51 = vld [vmem:[#allocation6 + $0x128] sm:$0xff] }
 0x165   :  { %2532 = vmatpush.bf16.msra.mxu1 %v4083_v46 }
 0x166   :  { %2540 = vmatpush.bf16.msra.mxu2 %v4097_v37  ;;  %v4100_v37 = vld [vmem:[#allocation6 + $0xc8] sm:$0xff] }
 0x167   :  { %2099 = vmatmul.bf16.vlgmr.msrb.gmra.mxu3 %v4306_v9  ;;  %v4095_v9 = vld [vmem:[#allocation6 + $0xa0] sm:$0xff]  ;;  %v1904_v22 = vpop.f32.mrf.mxu1 }
 0x168   :  { %2553 = vmatpush.bf16.msra.mxu3 %v4106_v3  ;;  %v4108_v3 = vld [vmem:[#allocation6 + $0x108] sm:$0xff] }
 0x169   :  { %v1834_v52 = vpop.f32.mrf.mxu0 }
 0x16a   :  { %2541 = vmatpush.bf16.msra.mxu2 %v4096_v40  ;;  %v1820_v47 = vpop.f32.mrf.mxu3  ;;  %v1808_v61 = vpop.f32.mrf.mxu2  ;;  %v1835_v10 = vadd.f32 %v1834_v52, %v798_v4 }
 0x16b   :  { %v1821_v56 = vadd.f32 %v1820_v47, %v1807_v55  ;;  %v1809_v58 = vadd.f32 %v1808_v61, %v1795_v54  ;;  %v4113_v61 = vld [vmem:[#allocation6 + $0x130] sm:$0xff]  ;;  %v4111_v54 = vld [vmem:[#allocation6 + $0x120] sm:$0xff]  ;;  %v4110_v55 = vld [vmem:[#allocation6 + $0x118] sm:$0xff] }
 0x16c   :  { %2554 = vmatpush.bf16.msra.mxu3 %v4105_v8  ;;  %v1849_v13 = vadd.f32 %v1848_v29, %v1835_v10  ;;  %v4107_v8 = vld [vmem:[#allocation6 + $0x100] sm:$0xff] }
 0x16d   :  { %v2105_v0 = vmax.f32 %v1821_v56, 0.0  ;;  %v800_v56 = vperm.slane %v4329_v38, 3 }
 0x16e   :  { %2542 = vmatpush.bf16.msra.mxu2 %v4095_v9  ;;  %v4114_v9 = vld [vmem:[#allocation6 + $0x138] sm:$0xff] }
 0x16f   :  { %v1906_v34 = vpop.f32.mrf.mxu1  ;;  %2567 = vmatpush.bf16.msrb.mxu0 %v4114_v9  ;;  %v802_v9 = vperm.slane %v4329_v38, 5 }
 0x170   :  { %2555 = vmatpush.bf16.msra.mxu3 %v4104_v12 }
 0x171   :  { %v1836_v5 = vpop.f32.mrf.mxu0 }
 0x172   :  { %2543 = vmatpush.bf16.msra.mxu2 %v4094_v48  ;;  %v1822_v59 = vpop.f32.mrf.mxu3  ;;  %v1862_v63 = vpop.f32.mrf.mxu2  ;;  %v1837_v14 = vadd.f32 %v1836_v5, %v798_v4 }
 0x173   :  { %v1823_v62 = vadd.f32 %v1822_v59, %v1809_v58  ;;  %v1863_v16 = vadd.f32 %v1862_v63, %v1849_v13  ;;  %2568 = vmatpush.bf16.msrb.mxu0 %v4113_v61 }
 0x174   :  { %v1851_v15 = vadd.f32 %v1850_v49, %v1837_v14  ;;  %2556 = vmatpush.bf16.msra.mxu3 %v4103_v21  ;;  %v4121_v14 = vld [vmem:[#allocation6 + $0x170] sm:$0xff]  ;;  %v4118_v21 = vld [vmem:[#allocation6 + $0x158] sm:$0xff] }
 0x175   :  { %v2111_v1 = vmax.f32 %v1823_v62, 0.0 }
 0x176   :  { %2544 = vmatpush.bf16.msra.mxu2 %v4093_v53 }
 0x177   :  { %v2117_v6 = vpack.c.bf16 %v2111_v1, %v2105_v0  ;;  %2569 = vmatpush.bf16.msrb.mxu0 %v4112_v51 }
 0x178   :  { %2557 = vmatpush.bf16.msra.mxu3 %v4102_v27 }
 0x179   :  { %2519 = vmatmul.bf16.vlgmr.msra.gmra.mxu0 %v2117_v6  ;;  %v1890_v17 = vpop.f32.mrf.mxu0 }
 0x17a   :  { %2545 = vmatpush.bf16.msra.mxu2 %v4092_v60  ;;  %v1876_v7 = vpop.f32.mrf.mxu3  ;;  %v1864_v11 = vpop.f32.mrf.mxu2  ;;  %v1891_v33 = vadd.f32 %v1890_v17, %v799_v30  ;;  %v4109_v60 = vld [vmem:[#allocation6 + $0x110] sm:$0xff] }
 0x17b   :  { %v1877_v18 = vadd.f32 %v1876_v7, %v1863_v16  ;;  %v1865_v19 = vadd.f32 %v1864_v11, %v1851_v15  ;;  %2570 = vmatpush.bf16.msrb.mxu0 %v4111_v54  ;;  %v4122_v11 = vld [vmem:[#allocation6 + $0x178] sm:$0xff]  ;;  %v4120_v16 = vld [vmem:[#allocation6 + $0x168] sm:$0xff] }
 0x17c   :  { %2558 = vmatpush.bf16.msra.mxu3 %v4101_v31  ;;  %v1905_v35 = vadd.f32 %v1904_v22, %v1891_v33  ;;  %2581 = vmatpush.bf16.msrb.mxu1 %v4122_v11  ;;  %v801_v22 = vperm.slane %v4329_v38, 4 }
 0x17d   :  { %v2106_v24 = vmax.f32 %v1877_v18, 0.0 }
 0x17e   :  { %2546 = vmatpush.bf16.msra.mxu2 %v4091_v2 }
 0x17f   :  { %2571 = vmatpush.bf16.msrb.mxu0 %v4110_v55 }
 0x180   :  { %2559 = vmatpush.bf16.msra.mxu3 %v4100_v37  ;;  %2582 = vmatpush.bf16.msrb.mxu1 %v4121_v14  ;;  %v4115_v37 = vld [vmem:[#allocation6 + $0x140] sm:$0xff] }
 0x181   :  { %v1892_v45 = vpop.f32.mrf.mxu0 }
 0x182   :  { %v1878_v20 = vpop.f32.mrf.mxu3  ;;  %v1918_v26 = vpop.f32.mrf.mxu2  ;;  %v1893_v36 = vadd.f32 %v1892_v45, %v799_v30  ;;  %v4116_v45 = vld [vmem:[#allocation6 + $0x148] sm:$0xff] }
 0x183   :  { %v1879_v23 = vadd.f32 %v1878_v20, %v1865_v19  ;;  %v1919_v42 = vadd.f32 %v1918_v26, %v1905_v35  ;;  %2572 = vmatpush.bf16.msrb.mxu0 %v4109_v60  ;;  %v4119_v19 = vld [vmem:[#allocation6 + $0x160] sm:$0xff] }
 0x184   :  { %v1907_v40 = vadd.f32 %v1906_v34, %v1893_v36  ;;  %2560 = vmatpush.bf16.msra.mxu3 %v4099_v44  ;;  %2583 = vmatpush.bf16.msrb.mxu1 %v4120_v16 }
 0x185   :  { %v2112_v25 = vmax.f32 %v1879_v23, 0.0  ;;  %v1960_v53 = vpop.f32.mrf.mxu1 }
 0x187   :  { %v2118_v28 = vpack.c.bf16 %v2112_v25, %v2106_v24  ;;  %2573 = vmatpush.bf16.msrb.mxu0 %v4108_v3  ;;  %v4117_v25 = vld [vmem:[#allocation6 + $0x150] sm:$0xff] }
 0x188   :  { %2584 = vmatpush.bf16.msrb.mxu1 %v4119_v19 }
 0x189   :  { %2533 = vmatmul.bf16.vlgmr.msra.gmra.mxu1 %v2118_v28  ;;  %v1946_v52 = vpop.f32.mrf.mxu0 }
 0x18a   :  { %v1932_v32 = vpop.f32.mrf.mxu3  ;;  %v1920_v39 = vpop.f32.mrf.mxu2  ;;  %v1947_v62 = vadd.f32 %v1946_v52, %v800_v56 }
 0x18b   :  { %v1933_v41 = vadd.f32 %v1932_v32, %v1919_v42  ;;  %v1921_v43 = vadd.f32 %v1920_v39, %v1907_v40  ;;  %2574 = vmatpush.bf16.msrb.mxu0 %v4107_v8 }
 0x18c   :  { %v1961_v0 = vadd.f32 %v1960_v53, %v1947_v62  ;;  %2585 = vmatpush.bf16.msrb.mxu1 %v4118_v21 }
 0x18d   :  { %v2107_v47 = vmax.f32 %v1933_v41, 0.0  ;;  %v1962_v63 = vpop.f32.mrf.mxu1 }
 0x190   :  { %2586 = vmatpush.bf16.msrb.mxu1 %v4117_v25 }
 0x191   :  { %v1948_v58 = vpop.f32.mrf.mxu0 }
 0x192   :  { %v1934_v46 = vpop.f32.mrf.mxu3  ;;  %v1949_v1 = vadd.f32 %v1948_v58, %v800_v56 }
 0x193   :  { %v1935_v57 = vadd.f32 %v1934_v46, %v1921_v43 }
 0x194   :  { %v1963_v4 = vadd.f32 %v1962_v63, %v1949_v1  ;;  %2587 = vmatpush.bf16.msrb.mxu1 %v4116_v45  ;;  %v4132_v1 = vld [vmem:[%s4352_s6] ss:$0 sm:$0xff] }
 0x195   :  { %v2113_v48 = vmax.f32 %v1935_v57, 0.0 }
 0x197   :  { %v2119_v50 = vpack.c.bf16 %v2113_v48, %v2107_v47 }
 0x198   :  { %2588 = vmatpush.bf16.msrb.mxu1 %v4115_v37 }
 0x199   :  { %2547 = vmatmul.bf16.vlgmr.msra.gmra.mxu2 %v2119_v50 }
 0x19d   :  { %v2002_v17 = vpop.f32.mrf.mxu0 }
 0x19e   :  { %v2003_v26 = vadd.f32 %v2002_v17, %v801_v22 }
 0x1a5   :  { %v2016_v18 = vpop.f32.mrf.mxu1  ;;  %v2004_v23 = vpop.f32.mrf.mxu0 }
 0x1a6   :  { %v1974_v29 = vpop.f32.mrf.mxu2  ;;  %v2017_v28 = vadd.f32 %v2016_v18, %v2003_v26  ;;  %v2005_v30 = vadd.f32 %v2004_v23, %v801_v22 }
 0x1a7   :  { %v1975_v5 = vadd.f32 %v1974_v29, %v1961_v0 }
 0x1aa   :  { %v1988_v59 = vpop.f32.mrf.mxu3 }
 0x1ab   :  { %v1989_v6 = vadd.f32 %v1988_v59, %v1975_v5 }
 0x1ad   :  { %v2108_v12 = vmax.f32 %v1989_v6, 0.0  ;;  %v2018_v27 = vpop.f32.mrf.mxu1 }
 0x1ae   :  { %v1976_v2 = vpop.f32.mrf.mxu2  ;;  %v2019_v32 = vadd.f32 %v2018_v27, %v2005_v30 }
 0x1af   :  { %v1977_v49 = vadd.f32 %v1976_v2, %v1963_v4 }
 0x1b2   :  { %v1990_v7 = vpop.f32.mrf.mxu3 }
 0x1b3   :  { %v1991_v10 = vadd.f32 %v1990_v7, %v1977_v49 }
 0x1b5   :  { %v2114_v13 = vmax.f32 %v1991_v10, 0.0 }
 0x1b7   :  { %v2120_v15 = vpack.c.bf16 %v2114_v13, %v2108_v12 }
 0x1b9   :  { %2561 = vmatmul.bf16.vlgmr.msra.gmra.mxu3 %v2120_v15 }
 0x1bd   :  { %v2058_v43 = vpop.f32.mrf.mxu0 }
 0x1be   :  { %v2059_v48 = vadd.f32 %v2058_v43, %v802_v9 }
 0x1c4   :  { %v2030_v20 = vpop.f32.mrf.mxu2 }
 0x1c5   :  { %v2031_v33 = vadd.f32 %v2030_v20, %v2017_v28  ;;  %v2072_v44 = vpop.f32.mrf.mxu1  ;;  %v2060_v57 = vpop.f32.mrf.mxu0 }
 0x1c6   :  { %v2073_v50 = vadd.f32 %v2072_v44, %v2059_v48  ;;  %v2061_v51 = vadd.f32 %v2060_v57, %v802_v9 }
 0x1ca   :  { %v2044_v24 = vpop.f32.mrf.mxu3 }
 0x1cb   :  { %v2045_v34 = vadd.f32 %v2044_v24, %v2031_v33 }
 0x1cc   :  { %v2032_v31 = vpop.f32.mrf.mxu2 }
 0x1cd   :  { %v2033_v35 = vadd.f32 %v2032_v31, %v2019_v32  ;;  %v2109_v40 = vmax.f32 %v2045_v34, 0.0  ;;  %v2074_v61 = vpop.f32.mrf.mxu1 }
 0x1ce   :  { %v2075_v53 = vadd.f32 %v2074_v61, %v2061_v51 }
 0x1d2   :  { %v2046_v36 = vpop.f32.mrf.mxu3 }
 0x1d3   :  { %v2047_v39 = vadd.f32 %v2046_v36, %v2033_v35 }
 0x1d5   :  { %v2115_v42 = vmax.f32 %v2047_v39, 0.0 }
 0x1d7   :  { %v2121_v41 = vpack.c.bf16 %v2115_v42, %v2109_v40 }
 0x1d9   :  { %2575 = vmatmul.bf16.vlgmr.msrb.gmra.mxu0 %v2121_v41 }
 0x1e4   :  { %v2086_v46 = vpop.f32.mrf.mxu2 }
 0x1e5   :  { %v2087_v54 = vadd.f32 %v2086_v46, %v2073_v50 }
 0x1ea   :  { %v2100_v47 = vpop.f32.mrf.mxu3 }
 0x1eb   :  { %v2101_v29 = vadd.f32 %v2100_v47, %v2087_v54 }
 0x1ec   :  { %v2088_v52 = vpop.f32.mrf.mxu2 }
 0x1ed   :  { %v2089_v55 = vadd.f32 %v2088_v52, %v2075_v53  ;;  %v2110_v59 = vmax.f32 %v2101_v29, 0.0 }
 0x1f2   :  { %v2102_v56 = vpop.f32.mrf.mxu3 }
 0x1f3   :  { %v2103_v58 = vadd.f32 %v2102_v56, %v2089_v55 }
 0x1f5   :  { %v2116_v60 = vmax.f32 %v2103_v58, 0.0 }
 0x1f6   :  { %v2520_v63 = vpop.f32.mrf.mxu0 }
 0x1f7   :  { %v2122_v62 = vpack.c.bf16 %v2116_v60, %v2110_v59  ;;  %v2521_v3 = vadd.f32 %v4132_v1, %v2520_v63 }
 0x1f9   :  { %2589 = vmatmul.bf16.vlgmr.msrb.gmra.mxu1 %v2122_v62 }
 0x1fe   :  { %v2522_v38 = vpop.f32.mrf.mxu0 }
 0x1ff   :  { %v2523_v10 = vadd.f32 %v4132_v1, %v2522_v38 }
 0x206   :  { %v2534_v0 = vpop.f32.mrf.mxu1 }
 0x207   :  { %v2535_v6 = vadd.f32 %v2534_v0, %v2521_v3 }
 0x20e   :  { %v2536_v4 = vpop.f32.mrf.mxu1 }
 0x20f   :  { %v2537_v14 = vadd.f32 %v2536_v4, %v2523_v10 }
 0x21c   :  { %v2548_v2 = vpop.f32.mrf.mxu2 }
 0x21d   :  { %v2549_v7 = vadd.f32 %v2548_v2, %v2535_v6 }
 0x224   :  { %v2550_v12 = vpop.f32.mrf.mxu2 }
 0x225   :  { %v2551_v17 = vadd.f32 %v2550_v12, %v2537_v14 }
 0x23c   :  { %v2562_v5 = vpop.f32.mrf.mxu3 }
 0x23d   :  { %v2563_v8 = vadd.f32 %v2562_v5, %v2549_v7 }
 0x244   :  { %v2564_v16 = vpop.f32.mrf.mxu3 }
 0x245   :  { %v2565_v19 = vadd.f32 %v2564_v16, %v2551_v17 }
 0x256   :  { %v2576_v49 = vpop.f32.mrf.mxu0 }
 0x257   :  { %v2577_v11 = vadd.f32 %v2576_v49, %v2563_v8 }
 0x25e   :  { %v2578_v18 = vpop.f32.mrf.mxu0 }
 0x25f   :  { %v2579_v20 = vadd.f32 %v2578_v18, %v2565_v19 }
 0x276   :  { %v2590_v13 = vpop.f32.mrf.mxu1 }
 0x277   :  { %v2591_v15 = vadd.f32 %v2590_v13, %v2577_v11 }
 0x279   :  { %2595 = vst [vmem:[%s4353_s7] sm:$0xff] %v2591_v15 }
 0x27e   :  { %v2592_v21 = vpop.f32.mrf.mxu1 }
 0x27f   :  { %v2593_v22 = vadd.f32 %v2592_v21, %v2579_v20 }
 0x281   :  { %2596 = vst [vmem:[%s4353_s7 + $0x8] sm:$0xff] %v2593_v22 }
 0x282   :  { %2601 = vsyncpa [#allocation3], 1 }
 0x283   :  { %2602 = vsyncpa [#allocation5], 1 }

</bundles_post_ra>
